<compile_context>
chip_gen: v7x
topology: tpu7x:2x2x1
jax: 0.10.0
libtpu: 0.0.40
codegen_flags: <defaults>
</compile_context>

<pallas_src>
import math
from functools import partial

import jax
import jax.numpy as jnp
from jax import lax
from jax.experimental import pallas as pl
from jax.experimental.pallas import tpu as pltpu


def _mqa_kernel(x_ref, k_ref, v_ref, wq_ref, bq_ref, wout_ref, bout_ref, *rest,
                n_heads, head_dim, tq, needs_weights, compute_dtype, exp_dtype,
                approx_recip):
    if needs_weights:
        out_ref, attnw_ref = rest[:2]
        qh_s, ctx_s = rest[2:]
    else:
        out_ref = rest[0]
        attnw_ref = None
        qh_s, ctx_s = rest[1:]

    S = k_ref.shape[1]

    # ---- Q projection for this query tile (softmax scale folded into Wq/bq) --
    q_t = jnp.dot(x_ref[0], wq_ref[...],
                  preferred_element_type=jnp.float32) + bq_ref[...]   # (tq, D)

    # Pack heads into one (n_heads*tq, hd) slab -> ONE MXU call for scores.
    # TODO(synk): for head_dim < 128 these column slices are not lane-aligned
    # (masked stores); a head-major ctx layout + external out-projection would
    # remove them at the cost of de-fusing the epilogue.
    for h in range(n_heads):
        qh_s[h * tq:(h + 1) * tq, :] = (
            q_t[:, h * head_dim:(h + 1) * head_dim].astype(compute_dtype))

    k_t = k_ref[0]                                                    # (S, hd)
    v_t = v_ref[0]                                                    # (S, hd)

    # scores[h*tq + q, s] = q_h . k_s  -- K consumed in stored layout (no XLU).
    scores = lax.dot_general(qh_s[...], k_t, (((1,), (1,)), ((), ())),
                             preferred_element_type=jnp.float32)      # (H*tq, S)

    # Numerically-stable softmax with DEFERRED normalization.
    m = jnp.max(scores, axis=-1, keepdims=True)
    e = jnp.exp((scores - m).astype(exp_dtype))        # bf16 EUP on v6e/v7x
    rowsum = jnp.sum(e.astype(jnp.float32), axis=-1, keepdims=True)   # f32
    inv = pl.reciprocal(rowsum, approx=approx_recip)                  # (H*tq, 1)

    ctx = jnp.dot(e.astype(compute_dtype), v_t,
                  preferred_element_type=jnp.float32)                 # (H*tq, hd)
    ctx = ctx * inv                      # normalize the small array, not (.., S)

    if needs_weights:
        p = e.astype(jnp.float32) * inv
        attnw_ref[0] = p.reshape(n_heads, tq, S).astype(attnw_ref.dtype)

    # Un-pack heads into a lane-dense (tq, D) slab (no concatenate/transpose).
    for h in range(n_heads):
        ctx_s[:, h * head_dim:(h + 1) * head_dim] = (
            ctx[h * tq:(h + 1) * tq, :].astype(compute_dtype))

    out = jnp.dot(ctx_s[...], wout_ref[...],
                  preferred_element_type=jnp.float32) + bout_ref[...]
    out_ref[0] = out.astype(out_ref.dtype)


def _vmem_capacity_bytes():
    try:
        return int(pltpu.get_tpu_info().vmem_capacity_bytes)
    except Exception:
        return 64 * 1024 * 1024      # conservative (v7x per-TensorCore VMEM)


def _supports_bf16_eup():
    # bf16 EUP/VPU exists on v6e/v7x, NOT on v5e (would be emulated there).
    try:
        kind = jax.devices()[0].device_kind.lower()
    except Exception:
        return False
    return any(tag in kind for tag in ("v6", "v7", "7x"))


def _candidate_tiles(S, pack, max_tq):
    """Query-tile candidates: full-seq first, then sublane-pack multiples."""
    cands = []
    if S <= max_tq:
        cands.append(S)                       # full-extent block: always legal
    t = (min(max_tq, S - 1) // pack) * pack
    while t >= pack:
        if S % t == 0:
            cands.append(t)
        t -= pack
    return cands


def multi_query_attention(x, wqkv, bqkv, wout, bout, *, n_heads,
                          softmax_scale=None, needs_weights=False,
                          compute_dtype=jnp.bfloat16,
                          attn_weights_dtype=jnp.bfloat16,
                          approx_reciprocal=True,
                          bf16_exp=None,
                          max_q_tile=256):
    B, S, D = x.shape
    assert D % n_heads == 0
    head_dim = D // n_heads
    scale = float(softmax_scale) if softmax_scale is not None else 1.0 / math.sqrt(head_dim)
    cdt = jnp.dtype(compute_dtype)

    # exp dtype: bf16 only when the compute path is bf16 AND the chip has a
    # bf16 EUP (v6e/v7x); otherwise stay in f32 (v5e, or the precise path).
    if bf16_exp is None:
        bf16_exp = (cdt == jnp.dtype(jnp.bfloat16)) and _supports_bf16_eup()
    exp_dtype = jnp.dtype(jnp.bfloat16) if bf16_exp else jnp.dtype(jnp.float32)

    # Returned attention weights must be exactly normalized -> exact reciprocal
    # whenever weights are requested.
    use_approx = bool(approx_reciprocal) and not needs_weights

    # ---- one-time weight prep (wrapper side) -------------------------------
    # Fold the softmax scale into Wq/bq (removes a per-tile VPU multiply).
    wq = (wqkv[:, :D] * scale).astype(cdt)
    bq = (bqkv[:, :D] * scale).astype(jnp.float32)
    woutc = wout.astype(cdt)
    boutf = bout.astype(jnp.float32)

    # ---- K/V projection hoisted out of the kernel (tiny: S x 2*head_dim) ----
    kv = jnp.einsum('bsd,de->bse',
                    x.astype(jnp.float32), wqkv[:, D:].astype(jnp.float32),
                    precision=lax.Precision.HIGHEST) + bqkv[0, D:].astype(jnp.float32)
    k = kv[..., :head_dim].astype(cdt)                 # (B, S, hd)
    v = kv[..., head_dim:].astype(cdt)                 # (B, S, hd)

    xc = x.astype(cdt)

    # ---- VMEM-aware query-tile selection (per-generation capacity) ---------
    cb = cdt.itemsize
    eb = exp_dtype.itemsize
    ob = jnp.dtype(x.dtype).itemsize
    ab = jnp.dtype(attn_weights_dtype).itemsize if needs_weights else 0

    def vmem_est(t, wbuf=1):
        est = 2 * t * D * cb                            # x block (double-buffered)
        est += 2 * 2 * S * head_dim * cb                # K and V blocks
        est += wbuf * 2 * (D * D * cb + D * 4)          # Wq/bq + Wout/bout
        est += 2 * t * D * ob                           # output block
        if needs_weights:
            est += 2 * n_heads * t * S * ab             # attention-weights block
        est += (n_heads * t * head_dim + t * D) * cb    # scratch slabs
        est += n_heads * t * S * (4 + eb)               # f32 scores + exp temp
        if needs_weights:
            est += n_heads * t * S * 4                  # normalized probs temp
        est += t * D * 4 + n_heads * t * head_dim * 4   # q_t / ctx f32 temps
        return est

    capacity = _vmem_capacity_bytes()
    budget = int(0.80 * capacity)
    pack = 8 * max(1, 4 // cb)              # sublane pack: 8 (f32) / 16 (bf16)
    tq = None
    for t in _candidate_tiles(S, pack, max_q_tile):
        if vmem_est(t) <= budget:
            tq = t
            break
    if tq is None:
        raise ValueError(
            "MQA Pallas kernel: no query tile fits in VMEM "
            f"(S={S}, D={D}, n_heads={n_heads}, needs_weights={needs_weights}, "
            f"capacity={capacity} B). Reduce max_q_tile or disable needs_weights.")
    n_q_tiles = S // tq
    # Generation-aware scoped-VMEM limit with ~15% headroom (capped defensively).
    vmem_limit = min(int(0.85 * capacity), 112 * 1024 * 1024)

    kernel = partial(_mqa_kernel, n_heads=n_heads, head_dim=head_dim, tq=tq,
                     needs_weights=needs_weights, compute_dtype=cdt,
                     exp_dtype=exp_dtype, approx_recip=use_approx)

    out_shape = [jax.ShapeDtypeStruct((B, S, D), x.dtype)]
    out_specs = [pl.BlockSpec((1, tq, D), lambda b, q: (b, q, 0))]
    if needs_weights:
        out_shape.append(jax.ShapeDtypeStruct((B, n_heads, S, S), attn_weights_dtype))
        out_specs.append(pl.BlockSpec((1, n_heads, tq, S), lambda b, q: (b, 0, q, 0)))

    scratch_shapes = [
        pltpu.VMEM((n_heads * tq, head_dim), cdt),      # packed Q heads
        pltpu.VMEM((tq, D), cdt),                       # lane-dense context slab
    ]

    flops = (2 * B * S * D * D                          # Q projection
             + 4 * B * n_heads * S * S * head_dim       # q@k^T and attn@v
             + 2 * B * S * D * D)                       # output projection
    bytes_accessed = (xc.size * cb + k.size * cb + v.size * cb
                      + 2 * D * D * cb + 2 * D * 4
                      + B * S * D * ob
                      + B * n_heads * S * S * ab)
    cost = pl.CostEstimate(flops=int(flops),
                           transcendentals=int(B * n_heads * S * S),
                           bytes_accessed=int(bytes_accessed))

    def build_call(tuned):
        def const_spec(shape):
            # Grid-constant weight blocks: single-buffer them (saves one full
            # copy of the D x D weights in VMEM) when the jax version allows.
            if tuned and hasattr(pl, "Buffered"):
                return pl.BlockSpec(shape, lambda b, q: tuple(0 for _ in shape),
                                    pipeline_mode=pl.Buffered(1))
            return pl.BlockSpec(shape, lambda b, q: tuple(0 for _ in shape))

        in_specs = [
            pl.BlockSpec((1, tq, D), lambda b, q: (b, q, 0)),        # x tile
            pl.BlockSpec((1, S, head_dim), lambda b, q: (b, 0, 0)),  # K (per batch)
            pl.BlockSpec((1, S, head_dim), lambda b, q: (b, 0, 0)),  # V (per batch)
            const_spec((D, D)),                                      # Wq (scaled)
            const_spec((1, D)),                                      # bq (scaled)
            const_spec((D, D)),                                      # Wout
            const_spec((1, D)),                                      # bout
        ]
        return pl.pallas_call(
            kernel,
            out_shape=tuple(out_shape),
            grid_spec=pltpu.PrefetchScalarGridSpec(
                num_scalar_prefetch=0,
                grid=(B, n_q_tiles),
                in_specs=in_specs,
                out_specs=tuple(out_specs),
                scratch_shapes=scratch_shapes),
            compiler_params=pltpu.CompilerParams(
                # K/V are precomputed outside the kernel, so both grid axes are
                # stateless -> fully parallel (v7x megacore can shard q tiles).
                dimension_semantics=("parallel", "parallel"),
                vmem_limit_bytes=(vmem_limit if tuned else None)),
            cost_estimate=cost,
        )

    args = (xc, k, v, wq, bq, woutc, boutf)
    try:
        outs = build_call(tuned=True)(*args)
    except Exception:
        # Conservative fallback (default buffering / default VMEM limit) for
        # jax versions that reject the tuned configuration.
        outs = build_call(tuned=False)(*args)

    if needs_weights:
        out, attn_w = outs
        return out, attn_w
    (out,) = outs
    return out, None


def reference(x, wqkv, bqkv, wout, bout, *, n_heads):
    """Pure-JAX f32 reference mirroring the PyTorch module semantics."""
    B, S, D = x.shape
    hd = D // n_heads
    scale = 1.0 / math.sqrt(hd)
    qkv = jnp.einsum('bsd,de->bse', x, wqkv,
                     precision=jax.lax.Precision.HIGHEST) + bqkv[0]
    q, k, v = qkv[..., :D], qkv[..., D:D + hd], qkv[..., D + hd:]
    q = q.reshape(B, S, n_heads, hd).transpose(0, 2, 1, 3)        # b h s d
    kT = k.reshape(B, S, 1, hd).transpose(0, 2, 3, 1)             # b 1 d s
    v = v.reshape(B, S, 1, hd).transpose(0, 2, 1, 3)              # b 1 s d
    aw = jax.nn.softmax(jnp.matmul(q, kT,
                        precision=jax.lax.Precision.HIGHEST) * scale, axis=-1)
    ctx = jnp.matmul(aw, v, precision=jax.lax.Precision.HIGHEST)  # b h s d
    ctx = ctx.transpose(0, 2, 1, 3).reshape(B, S, D)
    out = jnp.einsum('bsd,de->bse', ctx, wout,
                     precision=jax.lax.Precision.HIGHEST) + bout[0]
    return out, aw


if __name__ == "__main__":
    # Small shapes consistent with the module.
    B, S = 2, 8
    d_model, n_heads = 32, 4
    head_dim = d_model // n_heads
    qkv_out = d_model + 2 * head_dim

    key = jax.random.PRNGKey(0)
    kx, k1, k2, k3, k4 = jax.random.split(key, 5)

    x = jax.random.normal(kx, (B, S, d_model), dtype=jnp.float32)

    # Deterministic "Linear" parameters, stored as [in, out] (pre-transposed).
    lim_qkv = 1.0 / math.sqrt(d_model)
    wqkv = jax.random.uniform(k1, (d_model, qkv_out), jnp.float32, -lim_qkv, lim_qkv)
    bqkv = jax.random.uniform(k2, (1, qkv_out), jnp.float32, -lim_qkv, lim_qkv)
    lim_out = 1.0 / math.sqrt(d_model)
    wout = jax.random.uniform(k3, (d_model, d_model), jnp.float32, -lim_out, lim_out)
    bout = jax.random.uniform(k4, (1, d_model), jnp.float32, -lim_out, lim_out)

    ref_out, ref_aw = reference(x, wqkv, bqkv, wout, bout, n_heads=n_heads)

    # 1) Fast path + attention weights (bf16 MXU/exp, exact recip for weights).
    out, attn_w = multi_query_attention(x, wqkv, bqkv, wout, bout,
                                        n_heads=n_heads, needs_weights=True)
    out = jax.block_until_ready(out)
    attn_w = jax.block_until_ready(attn_w)
    assert out.shape == (B, S, d_model)
    assert attn_w.shape == (B, n_heads, S, S)
    assert jnp.allclose(out, ref_out, atol=5e-2, rtol=5e-2)
    assert jnp.allclose(attn_w, ref_aw, atol=5e-2, rtol=5e-2)

    # 2) Reference-precision path: f32 matmuls, f32 exp, exact reciprocal.
    out32, aw32 = multi_query_attention(
        x, wqkv, bqkv, wout, bout, n_heads=n_heads, needs_weights=True,
        compute_dtype=jnp.float32, attn_weights_dtype=jnp.float32,
        approx_reciprocal=False, bf16_exp=False)
    out32 = jax.block_until_ready(out32)
    aw32 = jax.block_until_ready(aw32)
    assert jnp.allclose(out32, ref_out, atol=1e-3, rtol=1e-3)
    assert jnp.allclose(aw32, ref_aw, atol=1e-3, rtol=1e-3)

    # 3) Default path: no attention-weights writeback (drops the O(S^2) HBM
    #    output entirely), approx EUP reciprocal.
    out_nw, none_w = multi_query_attention(x, wqkv, bqkv, wout, bout,
                                           n_heads=n_heads)
    out_nw = jax.block_until_ready(out_nw)
    assert none_w is None
    assert jnp.allclose(out_nw, ref_out, atol=5e-2, rtol=5e-2)

    print("KERNEL_OK")
</pallas_src>

<mosaic_0001>
module attributes {stable_mosaic.version = 11 : i64} {
  func.func @_mqa_kernel(%arg0: i32, %arg1: i32, %arg2: memref<1x8x32xbf16, #tpu.memory_space<vmem>>, %arg3: memref<1x8x8xbf16, #tpu.memory_space<vmem>>, %arg4: memref<1x8x8xbf16, #tpu.memory_space<vmem>>, %arg5: memref<32x32xbf16, #tpu.memory_space<vmem>>, %arg6: memref<1x32xf32, #tpu.memory_space<vmem>>, %arg7: memref<32x32xbf16, #tpu.memory_space<vmem>>, %arg8: memref<1x32xf32, #tpu.memory_space<vmem>>, %arg9: memref<1x8x32xf32, #tpu.memory_space<vmem>>, %arg10: memref<1x4x8x8xbf16, #tpu.memory_space<vmem>>, %arg11: memref<32x8xbf16, #tpu.memory_space<vmem>>, %arg12: memref<8x32xbf16, #tpu.memory_space<vmem>>) attributes {dimension_semantics = [#tpu.dimension_semantics<parallel>, #tpu.dimension_semantics<parallel>], iteration_bounds = array<i64: 2, 1>, scalar_prefetch = 0 : i64, scratch_operands = 2 : i64, tpu.core_type = #tpu.core_type<tc>, window_params = [{transform_indices = @transform_0, window_bounds = array<i64: 1, 8, 32>}, {transform_indices = @transform_1, window_bounds = array<i64: 1, 8, 8>}, {transform_indices = @transform_2, window_bounds = array<i64: 1, 8, 8>}, {pipeline_mode = #tpu.pipeline_mode<synchronous>, transform_indices = @transform_3, window_bounds = array<i64: 32, 32>}, {pipeline_mode = #tpu.pipeline_mode<synchronous>, transform_indices = @transform_4, window_bounds = array<i64: 1, 32>}, {pipeline_mode = #tpu.pipeline_mode<synchronous>, transform_indices = @transform_5, window_bounds = array<i64: 32, 32>}, {pipeline_mode = #tpu.pipeline_mode<synchronous>, transform_indices = @transform_6, window_bounds = array<i64: 1, 32>}, {transform_indices = @transform_7, window_bounds = array<i64: 1, 8, 32>}, {transform_indices = @transform_8, window_bounds = array<i64: 1, 4, 8, 8>}]} {
    %c0 = arith.constant 0 : index
    %c0_0 = arith.constant 0 : index
    %c0_1 = arith.constant 0 : index
    %0 = vector.load %arg2[%c0, %c0_0, %c0_1] : memref<1x8x32xbf16, #tpu.memory_space<vmem>>, vector<1x8x32xbf16>
    %1 = vector.shape_cast %0 : vector<1x8x32xbf16> to vector<8x32xbf16>
    %c0_2 = arith.constant 0 : index
    %c0_3 = arith.constant 0 : index
    %2 = vector.load %arg5[%c0_2, %c0_3] : memref<32x32xbf16, #tpu.memory_space<vmem>>, vector<32x32xbf16>
    %cst = arith.constant dense<0.000000e+00> : vector<8x32xf32>
    %3 = tpu.matmul %1, %2, %cst {dimension_numbers = #tpu.dot_dimension_numbers<[1], [0], [0], [1], [0, 0, 1, 1], [], []>} : vector<8x32xbf16>, vector<32x32xbf16>, vector<8x32xf32> -> vector<8x32xf32>
    %c0_4 = arith.constant 0 : index
    %c0_5 = arith.constant 0 : index
    %4 = vector.load %arg6[%c0_4, %c0_5] : memref<1x32xf32, #tpu.memory_space<vmem>>, vector<1x32xf32>
    %5 = vector.broadcast %4 : vector<1x32xf32> to vector<8x32xf32>
    %6 = arith.addf %3, %5 : vector<8x32xf32>
    %7 = vector.extract_strided_slice %6 {offsets = [0, 0], sizes = [8, 8], strides = [1, 1]} : vector<8x32xf32> to vector<8x8xf32>
    %8 = arith.truncf %7 : vector<8x8xf32> to vector<8x8xbf16>
    %c0_6 = arith.constant 0 : index
    %c0_7 = arith.constant 0 : index
    %9 = vector.load %arg11[%c0_6, %c0_7] : memref<32x8xbf16, #tpu.memory_space<vmem>>, vector<8x8xbf16>
    tpu.vector_store %arg11[%c0_6, %c0_7], %8 {strides = array<i32>} : memref<32x8xbf16, #tpu.memory_space<vmem>>, vector<8x8xbf16>,
    %10 = vector.extract_strided_slice %6 {offsets = [0, 8], sizes = [8, 8], strides = [1, 1]} : vector<8x32xf32> to vector<8x8xf32>
    %11 = arith.truncf %10 : vector<8x8xf32> to vector<8x8xbf16>
    %c8 = arith.constant 8 : index
    %c0_8 = arith.constant 0 : index
    %12 = vector.load %arg11[%c8, %c0_8] : memref<32x8xbf16, #tpu.memory_space<vmem>>, vector<8x8xbf16>
    tpu.vector_store %arg11[%c8, %c0_8], %11 {strides = array<i32>} : memref<32x8xbf16, #tpu.memory_space<vmem>>, vector<8x8xbf16>,
    %13 = vector.extract_strided_slice %6 {offsets = [0, 16], sizes = [8, 8], strides = [1, 1]} : vector<8x32xf32> to vector<8x8xf32>
    %14 = arith.truncf %13 : vector<8x8xf32> to vector<8x8xbf16>
    %c16 = arith.constant 16 : index
    %c0_9 = arith.constant 0 : index
    %15 = vector.load %arg11[%c16, %c0_9] : memref<32x8xbf16, #tpu.memory_space<vmem>>, vector<8x8xbf16>
    tpu.vector_store %arg11[%c16, %c0_9], %14 {strides = array<i32>} : memref<32x8xbf16, #tpu.memory_space<vmem>>, vector<8x8xbf16>,
    %16 = vector.extract_strided_slice %6 {offsets = [0, 24], sizes = [8, 8], strides = [1, 1]} : vector<8x32xf32> to vector<8x8xf32>
    %17 = arith.truncf %16 : vector<8x8xf32> to vector<8x8xbf16>
    %c24 = arith.constant 24 : index
    %c0_10 = arith.constant 0 : index
    %18 = vector.load %arg11[%c24, %c0_10] : memref<32x8xbf16, #tpu.memory_space<vmem>>, vector<8x8xbf16>
    tpu.vector_store %arg11[%c24, %c0_10], %17 {strides = array<i32>} : memref<32x8xbf16, #tpu.memory_space<vmem>>, vector<8x8xbf16>,
    %c0_11 = arith.constant 0 : index
    %c0_12 = arith.constant 0 : index
    %c0_13 = arith.constant 0 : index
    %19 = vector.load %arg3[%c0_11, %c0_12, %c0_13] : memref<1x8x8xbf16, #tpu.memory_space<vmem>>, vector<1x8x8xbf16>
    %20 = vector.shape_cast %19 : vector<1x8x8xbf16> to vector<8x8xbf16>
    %c0_14 = arith.constant 0 : index
    %c0_15 = arith.constant 0 : index
    %c0_16 = arith.constant 0 : index
    %21 = vector.load %arg4[%c0_14, %c0_15, %c0_16] : memref<1x8x8xbf16, #tpu.memory_space<vmem>>, vector<1x8x8xbf16>
    %22 = vector.shape_cast %21 : vector<1x8x8xbf16> to vector<8x8xbf16>
    %c0_17 = arith.constant 0 : index
    %c0_18 = arith.constant 0 : index
    %23 = vector.load %arg11[%c0_17, %c0_18] : memref<32x8xbf16, #tpu.memory_space<vmem>>, vector<32x8xbf16>
    %cst_19 = arith.constant dense<0.000000e+00> : vector<32x8xf32>
    %24 = tpu.matmul %23, %20, %cst_19 {dimension_numbers = #tpu.dot_dimension_numbers<[1], [1], [0], [0], [0, 0, 1, 0], [], []>} : vector<32x8xbf16>, vector<8x8xbf16>, vector<32x8xf32> -> vector<32x8xf32>
    %cst_20 = arith.constant dense<0xFF800000> : vector<32xf32>
    %25 = vector.multi_reduction <maximumf>, %24, %cst_20 [1] : vector<32x8xf32> to vector<32xf32>
    %26 = vector.shape_cast %25 : vector<32xf32> to vector<32x1xf32>
    %27 = vector.broadcast %26 : vector<32x1xf32> to vector<32x8xf32>
    %28 = arith.subf %24, %27 : vector<32x8xf32>
    %29 = math.exp %28 : vector<32x8xf32>
    %cst_21 = arith.constant dense<0.000000e+00> : vector<32xf32>
    %30 = vector.multi_reduction <add>, %29, %cst_21 [1] : vector<32x8xf32> to vector<32xf32>
    %31 = vector.shape_cast %30 : vector<32xf32> to vector<32x1xf32>
    %32 = tpu.reciprocal %31 : vector<32x1xf32> -> vector<32x1xf32>
    %33 = arith.truncf %29 : vector<32x8xf32> to vector<32x8xbf16>
    %cst_22 = arith.constant dense<0.000000e+00> : vector<32x8xf32>
    %34 = tpu.matmul %33, %22, %cst_22 {dimension_numbers = #tpu.dot_dimension_numbers<[1], [0], [0], [1], [0, 0, 1, 1], [], []>} : vector<32x8xbf16>, vector<8x8xbf16>, vector<32x8xf32> -> vector<32x8xf32>
    %35 = vector.broadcast %32 : vector<32x1xf32> to vector<32x8xf32>
    %36 = arith.mulf %34, %35 : vector<32x8xf32>
    %37 = vector.broadcast %32 : vector<32x1xf32> to vector<32x8xf32>
    %38 = arith.mulf %29, %37 : vector<32x8xf32>
    %39 = vector.shape_cast %38 : vector<32x8xf32> to vector<4x8x8xf32>
    %40 = arith.truncf %39 : vector<4x8x8xf32> to vector<4x8x8xbf16>
    %c0_23 = arith.constant 0 : index
    %c0_24 = arith.constant 0 : index
    %c0_25 = arith.constant 0 : index
    %c0_26 = arith.constant 0 : index
    %41 = vector.load %arg10[%c0_23, %c0_24, %c0_25, %c0_26] : memref<1x4x8x8xbf16, #tpu.memory_space<vmem>>, vector<1x4x8x8xbf16>
    %42 = vector.shape_cast %41 : vector<1x4x8x8xbf16> to vector<4x8x8xbf16>
    %43 = vector.shape_cast %40 : vector<4x8x8xbf16> to vector<1x4x8x8xbf16>
    tpu.vector_store %arg10[%c0_23, %c0_24, %c0_25, %c0_26], %43 {strides = array<i32>} : memref<1x4x8x8xbf16, #tpu.memory_space<vmem>>, vector<1x4x8x8xbf16>,
    %44 = vector.extract_strided_slice %36 {offsets = [0, 0], sizes = [8, 8], strides = [1, 1]} : vector<32x8xf32> to vector<8x8xf32>
    %45 = arith.truncf %44 : vector<8x8xf32> to vector<8x8xbf16>
    %c0_27 = arith.constant 0 : index
    %c0_28 = arith.constant 0 : index
    %46 = vector.load %arg12[%c0_27, %c0_28] : memref<8x32xbf16, #tpu.memory_space<vmem>>, vector<8x8xbf16>
    tpu.vector_store %arg12[%c0_27, %c0_28], %45 {strides = array<i32>} : memref<8x32xbf16, #tpu.memory_space<vmem>>, vector<8x8xbf16>,
    %47 = vector.extract_strided_slice %36 {offsets = [8, 0], sizes = [8, 8], strides = [1, 1]} : vector<32x8xf32> to vector<8x8xf32>
    %48 = arith.truncf %47 : vector<8x8xf32> to vector<8x8xbf16>
    %c0_29 = arith.constant 0 : index
    %c8_30 = arith.constant 8 : index
    %49 = vector.load %arg12[%c0_29, %c8_30] : memref<8x32xbf16, #tpu.memory_space<vmem>>, vector<8x8xbf16>
    tpu.vector_store %arg12[%c0_29, %c8_30], %48 {strides = array<i32>} : memref<8x32xbf16, #tpu.memory_space<vmem>>, vector<8x8xbf16>,
    %50 = vector.extract_strided_slice %36 {offsets = [16, 0], sizes = [8, 8], strides = [1, 1]} : vector<32x8xf32> to vector<8x8xf32>
    %51 = arith.truncf %50 : vector<8x8xf32> to vector<8x8xbf16>
    %c0_31 = arith.constant 0 : index
    %c16_32 = arith.constant 16 : index
    %52 = vector.load %arg12[%c0_31, %c16_32] : memref<8x32xbf16, #tpu.memory_space<vmem>>, vector<8x8xbf16>
    tpu.vector_store %arg12[%c0_31, %c16_32], %51 {strides = array<i32>} : memref<8x32xbf16, #tpu.memory_space<vmem>>, vector<8x8xbf16>,
    %53 = vector.extract_strided_slice %36 {offsets = [24, 0], sizes = [8, 8], strides = [1, 1]} : vector<32x8xf32> to vector<8x8xf32>
    %54 = arith.truncf %53 : vector<8x8xf32> to vector<8x8xbf16>
    %c0_33 = arith.constant 0 : index
    %c24_34 = arith.constant 24 : index
    %55 = vector.load %arg12[%c0_33, %c24_34] : memref<8x32xbf16, #tpu.memory_space<vmem>>, vector<8x8xbf16>
    tpu.vector_store %arg12[%c0_33, %c24_34], %54 {strides = array<i32>} : memref<8x32xbf16, #tpu.memory_space<vmem>>, vector<8x8xbf16>,
    %c0_35 = arith.constant 0 : index
    %c0_36 = arith.constant 0 : index
    %56 = vector.load %arg12[%c0_35, %c0_36] : memref<8x32xbf16, #tpu.memory_space<vmem>>, vector<8x32xbf16>
    %c0_37 = arith.constant 0 : index
    %c0_38 = arith.constant 0 : index
    %57 = vector.load %arg7[%c0_37, %c0_38] : memref<32x32xbf16, #tpu.memory_space<vmem>>, vector<32x32xbf16>
    %cst_39 = arith.constant dense<0.000000e+00> : vector<8x32xf32>
    %58 = tpu.matmul %56, %57, %cst_39 {dimension_numbers = #tpu.dot_dimension_numbers<[1], [0], [0], [1], [0, 0, 1, 1], [], []>} : vector<8x32xbf16>, vector<32x32xbf16>, vector<8x32xf32> -> vector<8x32xf32>
    %c0_40 = arith.constant 0 : index
    %c0_41 = arith.constant 0 : index
    %59 = vector.load %arg8[%c0_40, %c0_41] : memref<1x32xf32, #tpu.memory_space<vmem>>, vector<1x32xf32>
    %60 = vector.broadcast %59 : vector<1x32xf32> to vector<8x32xf32>
    %61 = arith.addf %58, %60 : vector<8x32xf32>
    %c0_42 = arith.constant 0 : index
    %c0_43 = arith.constant 0 : index
    %c0_44 = arith.constant 0 : index
    %62 = vector.load %arg9[%c0_42, %c0_43, %c0_44] : memref<1x8x32xf32, #tpu.memory_space<vmem>>, vector<1x8x32xf32>
    %63 = vector.shape_cast %62 : vector<1x8x32xf32> to vector<8x32xf32>
    %64 = vector.shape_cast %61 : vector<8x32xf32> to vector<1x8x32xf32>
    tpu.vector_store %arg9[%c0_42, %c0_43, %c0_44], %64 {strides = array<i32>} : memref<1x8x32xf32, #tpu.memory_space<vmem>>, vector<1x8x32xf32>,
    return
  }
  func.func @transform_0(%arg0: i32, %arg1: i32) -> (i32, i32, i32) {
    %c0_i32 = arith.constant 0 : i32
    %c0_i32_0 = arith.constant 0 : i32
    return %arg0, %arg1, %c0_i32 : i32, i32, i32
  }
  func.func @transform_1(%arg0: i32, %arg1: i32) -> (i32, i32, i32) {
    %c0_i32 = arith.constant 0 : i32
    %c0_i32_0 = arith.constant 0 : i32
    %c0_i32_1 = arith.constant 0 : i32
    return %arg0, %c0_i32, %c0_i32_0 : i32, i32, i32
  }
  func.func @transform_2(%arg0: i32, %arg1: i32) -> (i32, i32, i32) {
    %c0_i32 = arith.constant 0 : i32
    %c0_i32_0 = arith.constant 0 : i32
    %c0_i32_1 = arith.constant 0 : i32
    return %arg0, %c0_i32, %c0_i32_0 : i32, i32, i32
  }
  func.func @transform_3(%arg0: i32, %arg1: i32) -> (i32, i32) {
    %c0_i32 = arith.constant 0 : i32
    %c0_i32_0 = arith.constant 0 : i32
    %c0_i32_1 = arith.constant 0 : i32
    return %c0_i32, %c0_i32_0 : i32, i32
  }
  func.func @transform_4(%arg0: i32, %arg1: i32) -> (i32, i32) {
    %c0_i32 = arith.constant 0 : i32
    %c0_i32_0 = arith.constant 0 : i32
    %c0_i32_1 = arith.constant 0 : i32
    return %c0_i32, %c0_i32_0 : i32, i32
  }
  func.func @transform_5(%arg0: i32, %arg1: i32) -> (i32, i32) {
    %c0_i32 = arith.constant 0 : i32
    %c0_i32_0 = arith.constant 0 : i32
    %c0_i32_1 = arith.constant 0 : i32
    return %c0_i32, %c0_i32_0 : i32, i32
  }
  func.func @transform_6(%arg0: i32, %arg1: i32) -> (i32, i32) {
    %c0_i32 = arith.constant 0 : i32
    %c0_i32_0 = arith.constant 0 : i32
    %c0_i32_1 = arith.constant 0 : i32
    return %c0_i32, %c0_i32_0 : i32, i32
  }
  func.func @transform_7(%arg0: i32, %arg1: i32) -> (i32, i32, i32) {
    %c0_i32 = arith.constant 0 : i32
    %c0_i32_0 = arith.constant 0 : i32
    return %arg0, %arg1, %c0_i32 : i32, i32, i32
  }
  func.func @transform_8(%arg0: i32, %arg1: i32) -> (i32, i32, i32, i32) {
    %c0_i32 = arith.constant 0 : i32
    %c0_i32_0 = arith.constant 0 : i32
    %c0_i32_1 = arith.constant 0 : i32
    return %arg0, %c0_i32, %arg1, %c0_i32_0 : i32, i32, i32, i32
  }
}

module attributes {stable_mosaic.version = 11 : i64} {
  func.func @_mqa_kernel(%arg0: i32, %arg1: i32, %arg2: memref<1x8x32xbf16, #tpu.memory_space<vmem>>, %arg3: memref<1x8x8xbf16, #tpu.memory_space<vmem>>, %arg4: memref<1x8x8xbf16, #tpu.memory_space<vmem>>, %arg5: memref<32x32xbf16, #tpu.memory_space<vmem>>, %arg6: memref<1x32xf32, #tpu.memory_space<vmem>>, %arg7: memref<32x32xbf16, #tpu.memory_space<vmem>>, %arg8: memref<1x32xf32, #tpu.memory_space<vmem>>, %arg9: memref<1x8x32xf32, #tpu.memory_space<vmem>>, %arg10: memref<1x4x8x8xbf16, #tpu.memory_space<vmem>>, %arg11: memref<32x8xbf16, #tpu.memory_space<vmem>>, %arg12: memref<8x32xbf16, #tpu.memory_space<vmem>>) attributes {dimension_semantics = [#tpu.dimension_semantics<parallel>, #tpu.dimension_semantics<parallel>], iteration_bounds = array<i64: 2, 1>, scalar_prefetch = 0 : i64, scratch_operands = 2 : i64, tpu.core_type = #tpu.core_type<tc>, window_params = [{transform_indices = @transform_0, window_bounds = array<i64: 1, 8, 32>}, {transform_indices = @transform_1, window_bounds = array<i64: 1, 8, 8>}, {transform_indices = @transform_2, window_bounds = array<i64: 1, 8, 8>}, {pipeline_mode = #tpu.pipeline_mode<synchronous>, transform_indices = @transform_3, window_bounds = array<i64: 32, 32>}, {pipeline_mode = #tpu.pipeline_mode<synchronous>, transform_indices = @transform_4, window_bounds = array<i64: 1, 32>}, {pipeline_mode = #tpu.pipeline_mode<synchronous>, transform_indices = @transform_5, window_bounds = array<i64: 32, 32>}, {pipeline_mode = #tpu.pipeline_mode<synchronous>, transform_indices = @transform_6, window_bounds = array<i64: 1, 32>}, {transform_indices = @transform_7, window_bounds = array<i64: 1, 8, 32>}, {transform_indices = @transform_8, window_bounds = array<i64: 1, 4, 8, 8>}]} {
    %c0 = arith.constant 0 : index
    %c0_0 = arith.constant 0 : index
    %c0_1 = arith.constant 0 : index
    %0 = vector.load %arg2[%c0, %c0_0, %c0_1] : memref<1x8x32xbf16, #tpu.memory_space<vmem>>, vector<1x8x32xbf16>
    %1 = vector.shape_cast %0 : vector<1x8x32xbf16> to vector<8x32xbf16>
    %c0_2 = arith.constant 0 : index
    %c0_3 = arith.constant 0 : index
    %2 = vector.load %arg5[%c0_2, %c0_3] : memref<32x32xbf16, #tpu.memory_space<vmem>>, vector<32x32xbf16>
    %cst = arith.constant dense<0.000000e+00> : vector<8x32xf32>
    %3 = tpu.matmul %1, %2, %cst {dimension_numbers = #tpu.dot_dimension_numbers<[1], [0], [0], [1], [0, 0, 1, 1], [], []>} : vector<8x32xbf16>, vector<32x32xbf16>, vector<8x32xf32> -> vector<8x32xf32>
    %c0_4 = arith.constant 0 : index
    %c0_5 = arith.constant 0 : index
    %4 = vector.load %arg6[%c0_4, %c0_5] : memref<1x32xf32, #tpu.memory_space<vmem>>, vector<1x32xf32>
    %5 = vector.broadcast %4 : vector<1x32xf32> to vector<8x32xf32>
    %6 = arith.addf %3, %5 : vector<8x32xf32>
    %7 = vector.extract_strided_slice %6 {offsets = [0, 0], sizes = [8, 8], strides = [1, 1]} : vector<8x32xf32> to vector<8x8xf32>
    %8 = arith.truncf %7 : vector<8x8xf32> to vector<8x8xbf16>
    %c0_6 = arith.constant 0 : index
    %c0_7 = arith.constant 0 : index
    %9 = vector.load %arg11[%c0_6, %c0_7] : memref<32x8xbf16, #tpu.memory_space<vmem>>, vector<8x8xbf16>
    tpu.vector_store %arg11[%c0_6, %c0_7], %8 {strides = array<i32>} : memref<32x8xbf16, #tpu.memory_space<vmem>>, vector<8x8xbf16>,
    %10 = vector.extract_strided_slice %6 {offsets = [0, 8], sizes = [8, 8], strides = [1, 1]} : vector<8x32xf32> to vector<8x8xf32>
    %11 = arith.truncf %10 : vector<8x8xf32> to vector<8x8xbf16>
    %c8 = arith.constant 8 : index
    %c0_8 = arith.constant 0 : index
    %12 = vector.load %arg11[%c8, %c0_8] : memref<32x8xbf16, #tpu.memory_space<vmem>>, vector<8x8xbf16>
    tpu.vector_store %arg11[%c8, %c0_8], %11 {strides = array<i32>} : memref<32x8xbf16, #tpu.memory_space<vmem>>, vector<8x8xbf16>,
    %13 = vector.extract_strided_slice %6 {offsets = [0, 16], sizes = [8, 8], strides = [1, 1]} : vector<8x32xf32> to vector<8x8xf32>
    %14 = arith.truncf %13 : vector<8x8xf32> to vector<8x8xbf16>
    %c16 = arith.constant 16 : index
    %c0_9 = arith.constant 0 : index
    %15 = vector.load %arg11[%c16, %c0_9] : memref<32x8xbf16, #tpu.memory_space<vmem>>, vector<8x8xbf16>
    tpu.vector_store %arg11[%c16, %c0_9], %14 {strides = array<i32>} : memref<32x8xbf16, #tpu.memory_space<vmem>>, vector<8x8xbf16>,
    %16 = vector.extract_strided_slice %6 {offsets = [0, 24], sizes = [8, 8], strides = [1, 1]} : vector<8x32xf32> to vector<8x8xf32>
    %17 = arith.truncf %16 : vector<8x8xf32> to vector<8x8xbf16>
    %c24 = arith.constant 24 : index
    %c0_10 = arith.constant 0 : index
    %18 = vector.load %arg11[%c24, %c0_10] : memref<32x8xbf16, #tpu.memory_space<vmem>>, vector<8x8xbf16>
    tpu.vector_store %arg11[%c24, %c0_10], %17 {strides = array<i32>} : memref<32x8xbf16, #tpu.memory_space<vmem>>, vector<8x8xbf16>,
    %c0_11 = arith.constant 0 : index
    %c0_12 = arith.constant 0 : index
    %c0_13 = arith.constant 0 : index
    %19 = vector.load %arg3[%c0_11, %c0_12, %c0_13] : memref<1x8x8xbf16, #tpu.memory_space<vmem>>, vector<1x8x8xbf16>
    %20 = vector.shape_cast %19 : vector<1x8x8xbf16> to vector<8x8xbf16>
    %c0_14 = arith.constant 0 : index
    %c0_15 = arith.constant 0 : index
    %c0_16 = arith.constant 0 : index
    %21 = vector.load %arg4[%c0_14, %c0_15, %c0_16] : memref<1x8x8xbf16, #tpu.memory_space<vmem>>, vector<1x8x8xbf16>
    %22 = vector.shape_cast %21 : vector<1x8x8xbf16> to vector<8x8xbf16>
    %c0_17 = arith.constant 0 : index
    %c0_18 = arith.constant 0 : index
    %23 = vector.load %arg11[%c0_17, %c0_18] : memref<32x8xbf16, #tpu.memory_space<vmem>>, vector<32x8xbf16>
    %cst_19 = arith.constant dense<0.000000e+00> : vector<32x8xf32>
    %24 = tpu.matmul %23, %20, %cst_19 {dimension_numbers = #tpu.dot_dimension_numbers<[1], [1], [0], [0], [0, 0, 1, 0], [], []>} : vector<32x8xbf16>, vector<8x8xbf16>, vector<32x8xf32> -> vector<32x8xf32>
    %cst_20 = arith.constant dense<0xFF800000> : vector<32xf32>
    %25 = vector.multi_reduction <maximumf>, %24, %cst_20 [1] : vector<32x8xf32> to vector<32xf32>
    %26 = vector.shape_cast %25 : vector<32xf32> to vector<32x1xf32>
    %27 = vector.broadcast %26 : vector<32x1xf32> to vector<32x8xf32>
    %28 = arith.subf %24, %27 : vector<32x8xf32>
    %29 = math.exp %28 : vector<32x8xf32>
    %cst_21 = arith.constant dense<0.000000e+00> : vector<32xf32>
    %30 = vector.multi_reduction <add>, %29, %cst_21 [1] : vector<32x8xf32> to vector<32xf32>
    %31 = vector.shape_cast %30 : vector<32xf32> to vector<32x1xf32>
    %32 = tpu.reciprocal %31 : vector<32x1xf32> -> vector<32x1xf32>
    %33 = arith.truncf %29 : vector<32x8xf32> to vector<32x8xbf16>
    %cst_22 = arith.constant dense<0.000000e+00> : vector<32x8xf32>
    %34 = tpu.matmul %33, %22, %cst_22 {dimension_numbers = #tpu.dot_dimension_numbers<[1], [0], [0], [1], [0, 0, 1, 1], [], []>} : vector<32x8xbf16>, vector<8x8xbf16>, vector<32x8xf32> -> vector<32x8xf32>
    %35 = vector.broadcast %32 : vector<32x1xf32> to vector<32x8xf32>
    %36 = arith.mulf %34, %35 : vector<32x8xf32>
    %37 = vector.broadcast %32 : vector<32x1xf32> to vector<32x8xf32>
    %38 = arith.mulf %29, %37 : vector<32x8xf32>
    %39 = vector.shape_cast %38 : vector<32x8xf32> to vector<4x8x8xf32>
    %40 = arith.truncf %39 : vector<4x8x8xf32> to vector<4x8x8xbf16>
    %c0_23 = arith.constant 0 : index
    %c0_24 = arith.constant 0 : index
    %c0_25 = arith.constant 0 : index
    %c0_26 = arith.constant 0 : index
    %41 = vector.load %arg10[%c0_23, %c0_24, %c0_25, %c0_26] : memref<1x4x8x8xbf16, #tpu.memory_space<vmem>>, vector<1x4x8x8xbf16>
    %42 = vector.shape_cast %41 : vector<1x4x8x8xbf16> to vector<4x8x8xbf16>
    %43 = vector.shape_cast %40 : vector<4x8x8xbf16> to vector<1x4x8x8xbf16>
    tpu.vector_store %arg10[%c0_23, %c0_24, %c0_25, %c0_26], %43 {strides = array<i32>} : memref<1x4x8x8xbf16, #tpu.memory_space<vmem>>, vector<1x4x8x8xbf16>,
    %44 = vector.extract_strided_slice %36 {offsets = [0, 0], sizes = [8, 8], strides = [1, 1]} : vector<32x8xf32> to vector<8x8xf32>
    %45 = arith.truncf %44 : vector<8x8xf32> to vector<8x8xbf16>
    %c0_27 = arith.constant 0 : index
    %c0_28 = arith.constant 0 : index
    %46 = vector.load %arg12[%c0_27, %c0_28] : memref<8x32xbf16, #tpu.memory_space<vmem>>, vector<8x8xbf16>
    tpu.vector_store %arg12[%c0_27, %c0_28], %45 {strides = array<i32>} : memref<8x32xbf16, #tpu.memory_space<vmem>>, vector<8x8xbf16>,
    %47 = vector.extract_strided_slice %36 {offsets = [8, 0], sizes = [8, 8], strides = [1, 1]} : vector<32x8xf32> to vector<8x8xf32>
    %48 = arith.truncf %47 : vector<8x8xf32> to vector<8x8xbf16>
    %c0_29 = arith.constant 0 : index
    %c8_30 = arith.constant 8 : index
    %49 = vector.load %arg12[%c0_29, %c8_30] : memref<8x32xbf16, #tpu.memory_space<vmem>>, vector<8x8xbf16>
    tpu.vector_store %arg12[%c0_29, %c8_30], %48 {strides = array<i32>} : memref<8x32xbf16, #tpu.memory_space<vmem>>, vector<8x8xbf16>,
    %50 = vector.extract_strided_slice %36 {offsets = [16, 0], sizes = [8, 8], strides = [1, 1]} : vector<32x8xf32> to vector<8x8xf32>
    %51 = arith.truncf %50 : vector<8x8xf32> to vector<8x8xbf16>
    %c0_31 = arith.constant 0 : index
    %c16_32 = arith.constant 16 : index
    %52 = vector.load %arg12[%c0_31, %c16_32] : memref<8x32xbf16, #tpu.memory_space<vmem>>, vector<8x8xbf16>
    tpu.vector_store %arg12[%c0_31, %c16_32], %51 {strides = array<i32>} : memref<8x32xbf16, #tpu.memory_space<vmem>>, vector<8x8xbf16>,
    %53 = vector.extract_strided_slice %36 {offsets = [24, 0], sizes = [8, 8], strides = [1, 1]} : vector<32x8xf32> to vector<8x8xf32>
    %54 = arith.truncf %53 : vector<8x8xf32> to vector<8x8xbf16>
    %c0_33 = arith.constant 0 : index
    %c24_34 = arith.constant 24 : index
    %55 = vector.load %arg12[%c0_33, %c24_34] : memref<8x32xbf16, #tpu.memory_space<vmem>>, vector<8x8xbf16>
    tpu.vector_store %arg12[%c0_33, %c24_34], %54 {strides = array<i32>} : memref<8x32xbf16, #tpu.memory_space<vmem>>, vector<8x8xbf16>,
    %c0_35 = arith.constant 0 : index
    %c0_36 = arith.constant 0 : index
    %56 = vector.load %arg12[%c0_35, %c0_36] : memref<8x32xbf16, #tpu.memory_space<vmem>>, vector<8x32xbf16>
    %c0_37 = arith.constant 0 : index
    %c0_38 = arith.constant 0 : index
    %57 = vector.load %arg7[%c0_37, %c0_38] : memref<32x32xbf16, #tpu.memory_space<vmem>>, vector<32x32xbf16>
    %cst_39 = arith.constant dense<0.000000e+00> : vector<8x32xf32>
    %58 = tpu.matmul %56, %57, %cst_39 {dimension_numbers = #tpu.dot_dimension_numbers<[1], [0], [0], [1], [0, 0, 1, 1], [], []>} : vector<8x32xbf16>, vector<32x32xbf16>, vector<8x32xf32> -> vector<8x32xf32>
    %c0_40 = arith.constant 0 : index
    %c0_41 = arith.constant 0 : index
    %59 = vector.load %arg8[%c0_40, %c0_41] : memref<1x32xf32, #tpu.memory_space<vmem>>, vector<1x32xf32>
    %60 = vector.broadcast %59 : vector<1x32xf32> to vector<8x32xf32>
    %61 = arith.addf %58, %60 : vector<8x32xf32>
    %c0_42 = arith.constant 0 : index
    %c0_43 = arith.constant 0 : index
    %c0_44 = arith.constant 0 : index
    %62 = vector.load %arg9[%c0_42, %c0_43, %c0_44] : memref<1x8x32xf32, #tpu.memory_space<vmem>>, vector<1x8x32xf32>
    %63 = vector.shape_cast %62 : vector<1x8x32xf32> to vector<8x32xf32>
    %64 = vector.shape_cast %61 : vector<8x32xf32> to vector<1x8x32xf32>
    tpu.vector_store %arg9[%c0_42, %c0_43, %c0_44], %64 {strides = array<i32>} : memref<1x8x32xf32, #tpu.memory_space<vmem>>, vector<1x8x32xf32>,
    return
  }
  func.func @transform_0(%arg0: i32, %arg1: i32) -> (i32, i32, i32) {
    %c0_i32 = arith.constant 0 : i32
    %c0_i32_0 = arith.constant 0 : i32
    return %arg0, %arg1, %c0_i32 : i32, i32, i32
  }
  func.func @transform_1(%arg0: i32, %arg1: i32) -> (i32, i32, i32) {
    %c0_i32 = arith.constant 0 : i32
    %c0_i32_0 = arith.constant 0 : i32
    %c0_i32_1 = arith.constant 0 : i32
    return %arg0, %c0_i32, %c0_i32_0 : i32, i32, i32
  }
  func.func @transform_2(%arg0: i32, %arg1: i32) -> (i32, i32, i32) {
    %c0_i32 = arith.constant 0 : i32
    %c0_i32_0 = arith.constant 0 : i32
    %c0_i32_1 = arith.constant 0 : i32
    return %arg0, %c0_i32, %c0_i32_0 : i32, i32, i32
  }
  func.func @transform_3(%arg0: i32, %arg1: i32) -> (i32, i32) {
    %c0_i32 = arith.constant 0 : i32
    %c0_i32_0 = arith.constant 0 : i32
    %c0_i32_1 = arith.constant 0 : i32
    return %c0_i32, %c0_i32_0 : i32, i32
  }
  func.func @transform_4(%arg0: i32, %arg1: i32) -> (i32, i32) {
    %c0_i32 = arith.constant 0 : i32
    %c0_i32_0 = arith.constant 0 : i32
    %c0_i32_1 = arith.constant 0 : i32
    return %c0_i32, %c0_i32_0 : i32, i32
  }
  func.func @transform_5(%arg0: i32, %arg1: i32) -> (i32, i32) {
    %c0_i32 = arith.constant 0 : i32
    %c0_i32_0 = arith.constant 0 : i32
    %c0_i32_1 = arith.constant 0 : i32
    return %c0_i32, %c0_i32_0 : i32, i32
  }
  func.func @transform_6(%arg0: i32, %arg1: i32) -> (i32, i32) {
    %c0_i32 = arith.constant 0 : i32
    %c0_i32_0 = arith.constant 0 : i32
    %c0_i32_1 = arith.constant 0 : i32
    return %c0_i32, %c0_i32_0 : i32, i32
  }
  func.func @transform_7(%arg0: i32, %arg1: i32) -> (i32, i32, i32) {
    %c0_i32 = arith.constant 0 : i32
    %c0_i32_0 = arith.constant 0 : i32
    return %arg0, %arg1, %c0_i32 : i32, i32, i32
  }
  func.func @transform_8(%arg0: i32, %arg1: i32) -> (i32, i32, i32, i32) {
    %c0_i32 = arith.constant 0 : i32
    %c0_i32_0 = arith.constant 0 : i32
    %c0_i32_1 = arith.constant 0 : i32
    return %arg0, %c0_i32, %arg1, %c0_i32_0 : i32, i32, i32, i32
  }
}

</mosaic_0001>

<bundles_post_ra>
// kernel: tpu_custom_call.1
= control target key start
LH: loop header
LB: loop body
LE: loop exit
PB: predicated region body
PF: predicated region fallthrough
CT: control target
= control target key end

     0   :  { %s1899_s0 = inlined_call_operand.hbm [shape: bf16[2,8,32], index: 0, kind: input, shape index: {}]   ;;  %s1900_s1 = inlined_call_operand.hbm [shape: bf16[2,8,8], index: 1, kind: input, shape index: {}]   ;;  %s1901_s2 = inlined_call_operand.hbm [shape: bf16[2,8,8], index: 2, kind: input, shape index: {}]   ;;  %s1902_s3 = inlined_call_operand.hbm [shape: bf16[32,32], index: 3, kind: input, shape index: {}]   ;;  %s1903_s4 = inlined_call_operand.vmem [shape: f32[1,32], index: 4, kind: input, shape index: {}]   ;;  %s1904_s5 = inlined_call_operand.vmem [shape: bf16[32,32], index: 5, kind: input, shape index: {}]   ;;  %s1905_s6 = inlined_call_operand.vmem [shape: f32[1,32], index: 6, kind: input, shape index: {}]   ;;  %s1906_s7 = inlined_call_operand.hbm [shape: f32[2,8,32], index: 7, kind: output, shape index: {0}]   ;;  %s1907_s8 = inlined_call_operand.hbm [shape: bf16[2,4,8,8], index: 8, kind: output, shape index: {1}]  }
   0x1   :  { %1929 = sst [smem:[#allocation28_spill]] %s1900_s1 }
   0x2   :  { %1930 = sst [smem:[#allocation29_spill]] %s1905_s6 }
   0x3   :  { %1931 = sst [smem:[#allocation30_spill]] %s1906_s7 }
   0x4   :  { %1932 = sst [smem:[#allocation31_spill]] %s1907_s8 }
   0x5   :  { %14 = vsyncpa [#allocation5], 0 }
   0x6   :  { %16 = vsyncpa [#allocation5 + $0x1], 0 }
   0x7   :  { %17 = vsyncpa [#allocation8], 0 }
   0x8   :  { %19 = vsyncpa [#allocation8 + $0x1], 0 }
   0x9   :  { %20 = vsyncpa [#allocation11], 0 }
   0xa   :  { %21 = vsyncpa [#allocation6], 0 }
   0xb   :  { %23 = vsyncpa [#allocation6 + $0x1], 0 }
   0xc   :  { %24 = vsyncpa [#allocation14], 0 }
   0xd   :  { %26 = vsyncpa [#allocation14 + $0x1], 0  ;;  %s1516_s27 = smov 0   ;;  %s1518_s28 = smov 0  }
   0xe   :  { %s1520_s29 = smov 0   ;;  %s1522_s30 = smov 0  }
   0xf   :  { %s1524_s9 = smov 0   ;;  %s1526_s10 = smov 0  }
  0x10 LB: > { %1933 = sst [smem:[#allocation20_spill]] %s1431_s27  ;;  %s44_s11 = sadd.s32 1, %s1447_s9  ;;  %s1451_s10 = sphi %s1526_s10, %s32_s10   ;;  %s1447_s9 = sphi %s1524_s9, %s1972_s9   ;;  %s1443_s30 = sphi %s1522_s30, %s1971_s30   ;;  %s1439_s29 = sphi %s1520_s29, %s1975_s29   ;;  %s1435_s28 = sphi %s1518_s28, %s1974_s28   ;;  %s1431_s27 = sphi %s1516_s27, %s1973_s27  }
  0x11   : > { %1934 = sst [smem:[#allocation21_spill]] %s1443_s30  ;;  %s53_s12 = sadd.s32 1, %s1439_s29 }
  0x12   : > { %1935 = sst [smem:[#allocation22_spill]] %s1447_s9  ;;  %p46_p0 = scmp.ge.s32.totalorder %s44_s11, 2 }
  0x13   : > { %1936 = sst [smem:[#allocation23_spill]] %s1451_s10  ;;  %p1909_p1 = scmp.ne.s32.totalorder %s1439_s29, %s1435_s28 }
  0x14   : > { %p61_p2 = scmp.eq.s32.totalorder %s1451_s10, 0  ;;  %s1977_s11 = smov (%p46_p0, %s44_s11), 0 }
  0x15   : > { %1937 = sst [smem:[#allocation24_spill]] %s1977_s11  ;;  %p1127_p5 = scmp.lt.s32.totalorder %s1451_s10, 2 }
  0x16   : > { %p62_p4 = por %p61_p2, %p1909_p1  ;;  %s48_s13 = ssub.s32 %s1447_s9, %s1977_s11 }
  0x17   : > { %s1908_s14 = sand.u32 1, %s1439_s29   ;;  %p51_p6 = scmp.eq.s32.totalorder %s48_s13, 0 }
  0x18   : > { %s1563_s15 = sshll.u32 %s1908_s14, 2  ;;  %s1566_s16 = sshll.u32 %s1447_s9, 6 }
  0x19   : > { %p1568_p7 = pnand %p1127_p5, %p62_p4  ;;  %s323_s19 = sand.u32 1, %s1451_s10  }
  0x1a   : > { %s1573_s18 = scalar_select %p51_p6, %s1439_s29, %s53_s12  }
  0x1b   : > { %s1938_s17 = scalar_select %p1568_p7, 1, 0 }
  0x1c   : > { %1939 = sst [smem:[#allocation25_spill]] %s1573_s18  ;;  %s1940_s1 = sld [smem:[#allocation28_spill]] }
  0x1d   : > { %s327_s23 = scalar_lea.vmem [#allocation7], %s1563_s15  ;;  %s1585_s25 = scalar_lea.sflag [#allocation8], %s323_s19 }
  0x1e   : > { %s334_s24 = sshll.u32 %s327_s23, 4  ;;  %p1591_p9 = pneg %p1568_p7  ;;  %s1583_s24 = int_to_ptr.vmem [resolvable:$true] %s334_s24 }
  0x20   : > { %s1941_s12 = scalar_select %p1591_p9, 1, 0 }
  0x22   : > { %s1580_s22 = scalar_lea.hbm %s1940_s1, %s1566_s16  ;;  %s1216_s21 = scalar_lea.hbm %s1940_s1, 128 }
  0x23   : > { %s1211_s26 = scalar_lea.hbm %s1580_s22, 64  ;;  %p1217_p12 = scmp.lt.u32.totalorder %s1580_s22, %s1940_s1 }
  0x24   : > { %p1212_p8 = scmp.ne.s32.totalorder %s1580_s22, %s1211_s26  ;;  %p1218_p13 = scmp.lt.u32.totalorder %s1216_s21, %s1211_s26 }
  0x25   : > { %p1220_p2 = scmp.lt.u32.totalorder %s1211_s26, %s1580_s22 }
  0x26   : > { %p1214_p10 = pnand %p1591_p9, %p1212_p8  ;;  %p1219_p0 = por %p1218_p13, %p1217_p12 }
  0x28   : > { %p1215_p11 = pneg %p1214_p10  ;;  %p1221_p4 = por %p1220_p2, %p1219_p0 }
  0x2a   : > { %p1222_p5 = pnand %p1221_p4, %p1215_p11 }
  0x2c   : > { %1225 = shalt.err (!%p1222_p5)
}
  0x2d   : > { %s1226_s19 = scalar_lea.vmem %s1583_s24, 64  ;;  %s1453_s13 = smov [#allocation7]  }
  0x2e   : > { %p1227_p6 = scmp.ne.s32.totalorder %s1583_s24, %s1226_s19  ;;  %s1231_s20 = sshll.u32 %s1453_s13, 4  ;;  %s1232_s20 = int_to_ptr.vmem [resolvable:$false] %s1231_s20 }
  0x2f   : > { %s1233_s14 = scalar_lea.vmem %s1232_s20, 128  ;;  %p1234_p3 = scmp.lt.s32.totalorder %s1583_s24, %s1232_s20 }
  0x30   : > { %p1229_p8 = pnand %p1227_p6, %p1591_p9  ;;  %p1235_p1 = scmp.lt.s32.totalorder %s1233_s14, %s1226_s19 }
  0x32   : > { %p1230_p10 = pneg %p1229_p8  ;;  %p1236_p12 = por %p1235_p1, %p1234_p3 }
  0x34   : > { %p1237_p13 = pnand %p1236_p12, %p1230_p10 }
  0x36   : > { %1240 = shalt.err (!%p1237_p13)
}
  0x37   : > { %1115 = dma.hbm_to_vmem [thread:$0]  (!%p1568_p7), %s1580_s22, 64, %s1583_s24, %s1585_s25  }
  0x38   : > { %s1616_s26 = sadd.s32 4294967295, %s1451_s10   ;;  %s1006_s21 = sadd.s32 4294967294, %s1451_s10  }
  0x39   : > { %p66_p1 = scmp.ne.s32.totalorder %s1435_s28, %s1431_s27  ;;  %p1917_p3 = scmp.eq.s32.totalorder %s1616_s26, 0 }
  0x3a   : > { %p228_p11 = scmp.eq.s32.totalorder %s1616_s26, 1  ;;  %p234_p0 = scmp.eq.s32.totalorder %s1006_s21, 1 }
  0x3b   : > { %p1007_p2 = scmp.ge.s32.totalorder %s1451_s10, 1  ;;  %p1626_p4 = por %p1917_p3, %p66_p1 }
  0x3c   : > { %p1943_p5 = scmp.ne.s32.totalorder %s1439_s29, %s1435_s28  ;;  %p1637_p8 = por %p234_p0, %p66_p1 }
  0x3d   : > { %s1942_s23 = scalar_select %p1626_p4, 1, 0 }
  0x3e   : > { %p1633_p6 = por %p228_p11, %p1943_p5  ;;  %p269_p10 = scmp.lt.s32.totalorder %s1451_s10, 3 }
  0x3f   : > { %s1946_s24 = scalar_select %p1637_p8, 1, 0 }
  0x40   : > { %s1944_s22 = scalar_select %p1633_p6, 1, 0 }
  0x41   : > { %1947 = sst [smem:[#allocation27_spill]] %s1946_s24  ;;  %p1642_p12 = pnand %p1007_p2, %p269_p10 }
  0x42   : > { %1945 = sst [smem:[#allocation26_spill]] %s1944_s22  ;;  %s1454_s13 = smov [#allocation10]  }
  0x43   : > { %s1948_s19 = scalar_select %p1642_p12, 1, 0 }
  0x44   : > { %s281_s20 = sshll.u32 %s1454_s13, 4  ;;  %p1105_p13 = pneg %p1642_p12  ;;  %s1646_s20 = int_to_ptr.vmem [resolvable:$true] %s281_s20 }
  0x45   : > { %s1660_s11 = scalar_lea.hbm %s1899_s0, %s1566_s16  ;;  %s308_s9 = scalar_lea.vmem [#allocation4], %s1563_s15 }
  0x46   : > { %p1652_p11 = pnand %p1105_p13, %p1917_p3  ;;  %s316_s18 = sshll.u32 %s308_s9, 4  ;;  %s1663_s18 = int_to_ptr.vmem [resolvable:$true] %s316_s18 }
  0x47   : > { %s1241_s24 = scalar_lea.hbm %s1902_s3, 256 }
  0x48   : > { %p1242_p1 = scmp.ne.s32.totalorder %s1902_s3, %s1241_s24  ;;  %p1243_p0 = pneg %p1652_p11 }
  0x49   : > { %p1248_p10 = scmp.lt.u32.totalorder %s1241_s24, %s1902_s3 }
  0x4a   : > { %p1244_p2 = pnand %p1243_p0, %p1242_p1 }
  0x4c   : > { %p1245_p5 = pneg %p1244_p2 }
  0x4e   : > { %p1250_p13 = pnand %p1248_p10, %p1245_p5 }
  0x50   : > { %1253 = shalt.err (!%p1250_p13)
}
  0x51   : > { %s1254_s9 = scalar_lea.vmem %s1646_s20, 256  ;;  %p1262_p4 = scmp.lt.s32.totalorder %s1646_s20, %s1646_s20 }
  0x52   : > { %p1255_p3 = scmp.ne.s32.totalorder %s1646_s20, %s1254_s9  ;;  %p1263_p12 = scmp.lt.s32.totalorder %s1254_s9, %s1254_s9 }
  0x54   : > { %p1257_p8 = pnand %p1255_p3, %p1243_p0  ;;  %p1264_p7 = por %p1263_p12, %p1262_p4 }
  0x56   : > { %p1258_p6 = pneg %p1257_p8 }
  0x58   : > { %p1265_p9 = pnand %p1264_p7, %p1258_p6 }
  0x5a   : > { %1268 = shalt.err (!%p1265_p9)
}
  0x5b   : > { %s1455_s7 = smov 64   ;;  %s1456_s27 = smov 4  }
  0x5c   : > { %1108 = dma.hbm_to_vmem [thread:$0]  (!%p1652_p11), %s1902_s3, 256, %s1646_s20, [#allocation11], %s1455_s7, %s1455_s7, %s1456_s27  }
  0x5d   : > { %s1950_s13 = sand.u32 1, %s1439_s29   ;;  %s1269_s21 = scalar_lea.hbm %s1660_s11, 64 }
  0x5e   : > { %s305_s1 = scalar_lea.sflag [#allocation5], %s1950_s13  ;;  %p1270_p7 = scmp.ne.s32.totalorder %s1660_s11, %s1269_s21 }
  0x5f   : > { %p1951_p9 = scmp.ne.s32.totalorder %s1941_s12, 0  ;;  %s1274_s8 = scalar_lea.hbm %s1899_s0, 128 }
  0x60   : > { %p1275_p6 = scmp.lt.u32.totalorder %s1660_s11, %s1899_s0  ;;  %p1276_p8 = scmp.lt.u32.totalorder %s1274_s8, %s1269_s21 }
  0x61   : > { %p1272_p3 = pnand %p1270_p7, %p1951_p9  ;;  %p1278_p1 = scmp.lt.u32.totalorder %s1269_s21, %s1660_s11 }
  0x62   : > { %p1277_p12 = por %p1276_p8, %p1275_p6 }
  0x63   : > { %p1273_p4 = pneg %p1272_p3 }
  0x64   : > { %p1279_p0 = por %p1278_p1, %p1277_p12 }
  0x66   : > { %p1280_p11 = pnand %p1279_p0, %p1273_p4 }
  0x68   : > { %1283 = shalt.err (!%p1280_p11)
}
  0x69   : > { %s1284_s20 = scalar_lea.vmem %s1663_s18, 64  ;;  %s1457_s6 = smov [#allocation4]  }
  0x6a   : > { %p1285_p2 = scmp.ne.s32.totalorder %s1663_s18, %s1284_s20  ;;  %s1289_s14 = sshll.u32 %s1457_s6, 4  ;;  %s1290_s14 = int_to_ptr.vmem [resolvable:$false] %s1289_s14 }
  0x6b   : > { %s1291_s30 = scalar_lea.vmem %s1290_s14, 128  ;;  %p1292_p13 = scmp.lt.s32.totalorder %s1663_s18, %s1290_s14 }
  0x6c   : > { %p1287_p5 = pnand %p1285_p2, %p1951_p9  ;;  %p1293_p7 = scmp.lt.s32.totalorder %s1291_s30, %s1284_s20 }
  0x6e   : > { %p1288_p10 = pneg %p1287_p5  ;;  %p1294_p3 = por %p1293_p7, %p1292_p13 }
  0x70   : > { %p1295_p6 = pnand %p1294_p3, %p1288_p10 }
  0x72   : > { %1298 = shalt.err (!%p1295_p6)
}
  0x73   : > { %p1952_p4 = scmp.ne.s32.totalorder %s1938_s17, 0  ;;  %s1713_s7 = scalar_lea.hbm %s1901_s2, %s1566_s16 }
  0x74   : > { %s345_s27 = scalar_lea.vmem [#allocation9], %s1563_s15  ;;  %s1299_s24 = scalar_lea.hbm %s1713_s7, 64 }
  0x75   : > { %1112 = dma.hbm_to_vmem [thread:$0]  (!%p1952_p4), %s1660_s11, 64, %s1663_s18, %s305_s1  }
  0x76   : > { %s352_s10 = sshll.u32 %s345_s27, 4  ;;  %p1300_p8 = scmp.ne.s32.totalorder %s1713_s7, %s1299_s24  ;;  %s353_s10 = int_to_ptr.vmem [resolvable:$true] %s352_s10 }
  0x77   : > { %s1304_s11 = scalar_lea.hbm %s1901_s2, 128  ;;  %p1305_p0 = scmp.lt.u32.totalorder %s1713_s7, %s1901_s2 }
  0x78   : > { %p1302_p12 = pnand %p1300_p8, %p1951_p9  ;;  %p1306_p11 = scmp.lt.u32.totalorder %s1304_s11, %s1299_s24 }
  0x79   : > { %p1308_p5 = scmp.lt.u32.totalorder %s1299_s24, %s1713_s7 }
  0x7a   : > { %p1303_p1 = pneg %p1302_p12  ;;  %p1307_p2 = por %p1306_p11, %p1305_p0 }
  0x7c   : > { %p1309_p10 = por %p1308_p5, %p1307_p2 }
  0x7e   : > { %p1310_p13 = pnand %p1309_p10, %p1303_p1 }
  0x80   : > { %1313 = shalt.err (!%p1310_p13)
}
  0x81   : > { %s1314_s15 = scalar_lea.vmem %s353_s10, 64  ;;  %s1458_s16 = smov [#allocation9]  }
  0x82   : > { %p1315_p7 = scmp.ne.s32.totalorder %s353_s10, %s1314_s15  ;;  %s1319_s9 = sshll.u32 %s1458_s16, 4  ;;  %s1320_s9 = int_to_ptr.vmem [resolvable:$false] %s1319_s9 }
  0x83   : > { %s1321_s20 = scalar_lea.vmem %s1320_s9, 128  ;;  %p1322_p8 = scmp.lt.s32.totalorder %s353_s10, %s1320_s9 }
  0x84   : > { %p1317_p3 = pnand %p1315_p7, %p1951_p9  ;;  %p1323_p12 = scmp.lt.s32.totalorder %s1321_s20, %s1314_s15 }
  0x86   : > { %p1318_p6 = pneg %p1317_p3  ;;  %p1324_p4 = por %p1323_p12, %p1322_p8 }
  0x88   : > { %p1325_p0 = pnand %p1324_p4, %p1318_p6 }
  0x8a   : > { %1328 = shalt.err (!%p1325_p0)
}
  0x8b   : > { %p1953_p11 = scmp.ne.s32.totalorder %s1938_s17, 0  ;;  %p1954_p1 = scmp.ne.s32.totalorder %s1948_s19, 0 }
  0x8c   : > { %s1737_s12 = sand.u32 (!%p1954_p1), 1, %s1435_s28   ;;  %p1955_p9 = scmp.ne.s32.totalorder (!%p1954_p1), %s1942_s23, 0 }
  0x8d   : > { %1118 = dma.hbm_to_vmem [thread:$0]  (!%p1953_p11), %s1713_s7, 64, %s353_s10, %s1585_s25  }
  0x8e   : > { %361 = sbr.rel (%p1954_p1) target bundleno = 1461 (0x5b5), region = 48  ;;  %s1740_s6 = sshll.u32 (!%p1954_p1), %s1737_s12, 2 }
  0x8f   : > { %s364_s14 = scalar_lea.sflag (!%p1954_p1), [#allocation5], %s1737_s12  ;;  %s367_s30 = scalar_lea.vmem (!%p1954_p1), [#allocation4], %s1740_s6 }
  0x95   : > { %1410 = dma.done.wait (%p1955_p9), %s364_s14, 64  }
  0x96   : > { %1412 = vsyncadd (%p1955_p9), %s364_s14, 4294967232  ;;  %s372_s17 = sand.u32 1, %s1616_s26   ;;  %s376_s19 = scalar_lea.vmem [#allocation7], %s1740_s6 }
  0x97   : > { %s373_s25 = scalar_lea.sflag [#allocation8], %s372_s17 }
  0x98   : > { %1414 = dma.done.wait (%p1955_p9), %s373_s25, 128  }
  0x99   : > { %1416 = vsyncadd (%p1955_p9), %s373_s25, 4294967168  ;;  %s385_s8 = scalar_lea.vmem [#allocation9], %s1740_s6  ;;  %p1956_p4 = scmp.eq.s32.totalorder %s1616_s26, 0 }
  0x9b   : > { %1418 = dma.done.wait (%p1956_p4), [#allocation11], 256   ;;  %p1957_p2 = pmov %p1956_p4 }
  0x9c   : > { %v1459_v0 = vmov 0.0   ;;  %vm1460_vm0 = vmmov 0   ;;  %v1191_v1 = vld [vmem:[#allocation10] sm:$0xff]   ;;  %v1192_v2 = vld [vmem:[#allocation10 + $0x8] sm:$0xff]   ;;  %vm462_vm1 = vcmask 261120   ;;  %vm528_vm2 = vcmask 64512  }
  0x9d   : > { %1420 = vsyncadd (%p1957_p2), [#allocation11], 4294967040  ;;  %1061 = vmatprep.subr.bf16.mxu0 %v1459_v0  ;;  %1065 = vmatprep.mubr.msk.bf16.mxu0 %vm1460_vm0, %v1459_v0  ;;  %v438_v3 = vld [vmem:[%s367_s30] sm:$0xf]  ;;  %v524_v4 = vld [vmem:[%s376_s19] sm:$0xf] }
  0x9e   : > { %1062 = vmatpush3.bf16.msra.mxu0 %v1191_v1  ;;  %v1023_v5 = vld [vmem:[%s1903_s4] ss:$0 sm:$0xff]  ;;  %1089 = vmatprep.subr.msk.bf16.mxu1 %vm528_vm2, %v524_v4  ;;  %v536_v6 = vsel %vm528_vm2, %v524_v4, 0  ;;  %vm507_vm3 = vcmask 60416   ;;  %s1461_s22 = smov 104   ;;  %s1462_s7 = smov 120  }
  0x9f   : > { %1063 = vmatprep.subr.bf16.mxu0 %v1459_v0  ;;  %1070 = vmatpush3.bf16.xpose.msra.mxu1 %v536_v6  ;;  %s1463_s27 = smov 112   ;;  %vm514_vm4 = vcmask 64516   ;;  %v525_v27 = vld [vmem:[%s385_s8] sm:$0xf]  ;;  %vm635_vm5 = vcmask 1043456   ;;  %s1022_s10 = sshll.u32 %s1737_s12, 4 }
  0xa0   : > { %1081 = vmatprep.subr.bf16.mxu1 %v1459_v0  ;;  %v637_v28 = vsel %vm635_vm5, %v525_v27, 0  ;;  %s1789_s24 = scalar_lea.vmem [#allocation13], %s1022_s10  ;;  %v1193_v4 = vld [vmem:[%s1904_s5] sm:$0xff]   ;;  %s1464_s1 = smov 16   ;;  %vm713_vm6 = vcmask 126016   ;;  %vm722_vm7 = vcmask 191616  }
  0xa1   : > { %s1958_s15 = sld [smem:[#allocation21_spill]]  ;;  %s1465_s16 = smov 8   ;;  %vm731_vm8 = vcmask 257216  }
  0xa2   : > { %1064 = vmatpush3.bf16.msra.mxu0 %v1192_v2  ;;  %s1466_s9 = smov 24   ;;  %s1959_s20 = sld [smem:[#allocation26_spill]] }
  0xa3   : > { %1090 = vmatprep.subr.msk.bf16.mxu0 %vm635_vm5, %v525_v27  ;;  %s835_s14 = sshll.u32 %s1789_s24, 4  ;;  %s1960_s25 = sld [smem:[#allocation31_spill]]  ;;  %s1815_s14 = int_to_ptr.vmem [resolvable:$true] %s835_s14 }
  0xa4   : > { %s807_s8 = scalar_lea.sflag [#allocation14], %s1737_s12  ;;  %s1329_s26 = scalar_lea.vmem %s1815_s14, 256 }
  0xa5   : > { %1066 = vmatmul.mubr.msk.bf16.vlgmr.msra.gmra.mrb[0].mxu0 %vm462_vm1, %v438_v3  ;;  %p1330_p5 = scmp.ne.s32.totalorder %s1815_s14, %s1329_s26  ;;  %s1467_s23 = smov [#allocation13]  }
  0xa6   : > { %1076 = vmatpush3.bf16.msra.mxu0 %v637_v28 }
  0xa7   : > { %s1048_s6 = sshll.u32 %s1958_s15, 8 }
  0xa8   : > { %p1961_p10 = scmp.ne.s32.totalorder %s1959_s20, 0 }
  0xa9   : > { %s1813_s19 = scalar_lea.hbm %s1960_s25, %s1048_s6 }
  0xaa   : > { %p1331_p13 = pnand %p1330_p5, %p1961_p10 }
  0xac   : > { %p1332_p7 = pneg %p1331_p13 }
 0x178   : > { %v500_v7 = vpop.f32.mrb[0].mxu0 }
 0x179   : > { %v501_v8 = vadd.f32 %v1023_v5, %v500_v7  ;;  %v1067_v9 = vpop.f32.mrb[1].mxu0  ;;  %v1194_v5 = vld [vmem:[%s1904_s5 + $0x8] sm:$0xff]  }
 0x17a   : > { %v503_v10 = vpop.f32.mrb[2].mxu0 }
 0x17b   : > { %v506_v11 = vpack.c.bf16 %v501_v8, %v501_v8  ;;  %v1068_v12 = vpop.f32.mrb[3].mxu0 }
 0x17d   : > { %508 = vst.msk [vmem:[#allocation2] sm:$0xf] %vm507_vm3, %v506_v11  ;;  %v510_v13 = vrot.slane %v506_v11, 4 }
 0x17f   : > { %520 = vrot.lane.b32.xlu1 %v510_v13, %s1461_s22  ;;  %511 = vrot.lane.b32.xlu0 %v510_v13, %s1462_s7  ;;  %s1333_s22 = sshll.u32 %s1467_s23, 4  ;;  %s1334_s22 = int_to_ptr.vmem [resolvable:$false] %s1333_s22 }
 0x180   : > { %s1335_s7 = scalar_lea.vmem %s1334_s22, 512  ;;  %p1336_p3 = scmp.lt.s32.totalorder %s1815_s14, %s1334_s22 }
 0x181   : > { %p1337_p6 = scmp.lt.s32.totalorder %s1335_s7, %s1329_s26 }
 0x183   : > { %516 = vrot.lane.b32.xlu0 %v506_v11, %s1463_s27  ;;  %p1338_p8 = por %p1337_p6, %p1336_p3 }
 0x185   : > { %p1339_p12 = pnand %p1338_p8, %p1332_p7 }
 0x1f1   : > { %v521_v14 = vpop.permute.xlu1 %520  ;;  %v512_v15 = vpop.permute.xlu0 %511 }
 0x1f2   : > { %523 = vst.msk [vmem:[#allocation2 + $0x8] sm:$0xf0] %vm514_vm4, %v521_v14  ;;  %515 = vst.msk [vmem:[#allocation2] sm:$0xf0] %vm514_vm4, %v512_v15 }
 0x1f5   : > { %v517_v16 = vpop.permute.xlu0 %516 }
 0x1f6   : > { %519 = vst.msk [vmem:[#allocation2 + $0x8] sm:$0xf] %vm507_vm3, %v517_v16 }
 0x1f9   : > { %v526_v17 = vld [vmem:[#allocation2] sm:$0xff] }
 0x1fa   : > { %1071 = vmatprep.mubr.msk.bf16.mxu1 %vm528_vm2, %v526_v17 }
 0x1fd   : > { %v527_v18 = vld [vmem:[#allocation2 + $0x8] sm:$0xff] }
 0x1fe   : > { %1072 = vmatmul.mubr.msk.bf16.vlgmr.msra.gmra.mrb[0].mxu1 %vm528_vm2, %v527_v18 }
 0x1ff   : > { %1085 = vmatprep.mubr.msk.bf16.mxu1 %vm1460_vm0, %v1459_v0  ;;  %1082 = vmatpush3.bf16.msra.mxu1 %v1193_v4 }
 0x200   : > { %1083 = vmatprep.subr.bf16.mxu1 %v1459_v0 }
 0x203   : > { %1084 = vmatpush3.bf16.msra.mxu1 %v1194_v5 }
 0x2d1   : > { %v1073_v19 = vpop.f32.mrb[0].mxu1 }
 0x2d2   : > { %v572_v20 = vpop.f32.mrb[1].mxu1  ;;  %v593_v26 = vsel %vm528_vm2, %v1073_v19, -inf }
 0x2d3   : > { %v1074_v21 = vpop.f32.mrb[2].mxu1  ;;  %v587_v22 = vsel %vm528_vm2, %v572_v20, -inf }
 0x2d4   : > { %588 = vmax.xlane.f32.xlu1 %v587_v22  ;;  %v575_v23 = vpop.f32.mrb[3].mxu1  ;;  %v596_v25 = vsel %vm528_vm2, %v1074_v21, -inf }
 0x2d5   : > { %v590_v24 = vsel %vm528_vm2, %v575_v23, -inf }
 0x2d6   : > { %591 = vmax.xlane.f32.xlu0 %v590_v24 }
 0x2d8   : > { %597 = vmax.xlane.f32.xlu1 %v596_v25 }
 0x2da   : > { %594 = vmax.xlane.f32.xlu0 %v593_v26 }
 0x361   : > { %v589_v29 = vpop.xlane.xlu1 %588 }
 0x362   : > { %v599_v30 = vsub.f32 %v572_v20, %v589_v29 }
 0x363   : > { %v592_v31 = vpop.xlane.xlu0 %591 }
 0x364   : > { %v603_v32 = vmul.f32 1.442695, %v599_v30  ;;  %v600_v33 = vsub.f32 %v575_v23, %v592_v31 }
 0x365   : > { %v598_v34 = vpop.xlane.xlu1 %597 }
 0x366   : > { %v605_v35 = vmul.f32 1.442695, %v600_v33  ;;  %v602_v36 = vsub.f32 %v1074_v21, %v598_v34  ;;  %1195 = vpow2.f32 %v603_v32 }
 0x367   : > { %v595_v37 = vpop.xlane.xlu0 %594 }
 0x368   : > { %1197 = vpow2.f32 %v605_v35  ;;  %v609_v38 = vmul.f32 1.442695, %v602_v36  ;;  %v601_v39 = vsub.f32 %v1073_v19, %v595_v37 }
 0x36a   : > { %1199 = vpow2.f32 %v609_v38  ;;  %v607_v40 = vmul.f32 1.442695, %v601_v39 }
 0x36c   : > { %1201 = vpow2.f32 %v607_v40 }
 0x370   : > { %v1196_v41 = vpop.eup %1195 }
 0x371   : > { %v611_v50 = vsel %vm528_vm2, %v1196_v41, 0.0 }
 0x372   : > { %v1198_v42 = vpop.eup %1197 }
 0x373   : > { %v614_v43 = vsel %vm528_vm2, %v1198_v42, 0.0  ;;  %v627_v44 = vpack.c.bf16 %v1198_v42, %v1196_v41 }
 0x374   : > { %v1200_v45 = vpop.eup %1199  ;;  %615 = vadd.xlane.f32.xlu0 %v614_v43 }
 0x375   : > { %1077 = vmatprep.mubr.msk.bf16.mxu0 %vm528_vm2, %v627_v44  ;;  %v620_v47 = vsel %vm528_vm2, %v1200_v45, 0.0 }
 0x376   : > { %v1202_v46 = vpop.eup %1201 }
 0x377   : > { %v617_v48 = vsel %vm528_vm2, %v1202_v46, 0.0  ;;  %v628_v49 = vpack.c.bf16 %v1200_v45, %v1202_v46 }
 0x378   : > { %621 = vadd.xlane.f32.xlu0 %v620_v47  ;;  %618 = vadd.xlane.f32.xlu1 %v617_v48 }
 0x379   : > { %1078 = vmatmul.mubr.msk.bf16.vlgmr.msra.gmra.mrb[4].mxu0 %vm528_vm2, %v628_v49 }
 0x37c   : > { %612 = vadd.xlane.f32.xlu1 %v611_v50 }
 0x401   : > { %v616_v51 = vpop.xlane.xlu0 %615 }
 0x402   : > { %1203 = vrcp.f32 %v616_v51 }
 0x405   : > { %v619_v52 = vpop.xlane.xlu1 %618  ;;  %v622_v53 = vpop.xlane.xlu0 %621 }
 0x406   : > { %1205 = vrcp.f32 %v619_v52 }
 0x407   : > { %1207 = vrcp.f32 %v622_v53 }
 0x409   : > { %v613_v54 = vpop.xlane.xlu1 %612 }
 0x40a   : > { %1209 = vrcp.f32 %v613_v54 }
 0x40c   : > { %v1204_v55 = vpop.eup %1203 }
 0x40d   : > { %v693_v56 = vmul.f32 %v1204_v55, %v1198_v42 }
 0x40f   : > { %v697_v57 = vpack.c.bf16 %v693_v56, %v693_v56 }
 0x410   : > { %v1206_v58 = vpop.eup %1205 }
 0x411   : > { %v1208_v59 = vpop.eup %1207  ;;  %701 = vst.msk [vmem:[%s1789_s24 + $0x4] sm:$0xf] %vm507_vm3, %v697_v57  ;;  %v694_v60 = vmul.f32 %v1206_v58, %v1202_v46 }
 0x412   : > { %v695_v61 = vmul.f32 %v1208_v59, %v1200_v45 }
 0x413   : > { %v698_v62 = vpack.c.bf16 %v694_v60, %v694_v60 }
 0x414   : > { %v1210_v63 = vpop.eup %1209  ;;  %v699_v1 = vpack.c.bf16 %v695_v61, %v695_v61 }
 0x415   : > { %702 = vst.msk [vmem:[%s1789_s24 + $0x8] sm:$0xf] %vm507_vm3, %v698_v62  ;;  %v692_v2 = vmul.f32 %v1210_v63, %v1196_v41 }
 0x416   : > { %703 = vst.msk [vmem:[%s1789_s24 + $0xc] sm:$0xf] %vm507_vm3, %v699_v1 }
 0x417   : > { %v696_v3 = vpack.c.bf16 %v692_v2, %v692_v2 }
 0x419   : > { %700 = vst.msk [vmem:[%s1789_s24] sm:$0xf] %vm507_vm3, %v696_v3 }
 0x44c   : > { %v1079_v6 = vpop.f32.mrb[4].mxu0 }
 0x44d   : > { %v690_v7 = vmul.f32 %v1206_v58, %v1079_v6  ;;  %v673_v8 = vpop.f32.mrb[5].mxu0 }
 0x44e   : > { %v688_v9 = vmul.f32 %v1210_v63, %v673_v8  ;;  %v1080_v10 = vpop.f32.mrb[6].mxu0 }
 0x44f   : > { %v1046_v11 = vpack.c.bf16 %v690_v7, %v690_v7  ;;  %v691_v12 = vmul.f32 %v1208_v59, %v1080_v10  ;;  %v676_v13 = vpop.f32.mrb[7].mxu0 }
 0x450   : > { %v704_v14 = vpack.c.bf16 %v688_v9, %v688_v9  ;;  %v689_v15 = vmul.f32 %v1204_v55, %v676_v13 }
 0x451   : > { %719 = vrot.lane.b32.xlu1 %v1046_v11, %s1464_s1  ;;  %v1047_v17 = vpack.c.bf16 %v691_v12, %v691_v12 }
 0x452   : > { %705 = vst.msk [vmem:[#allocation3] sm:$0xf] %vm507_vm3, %v704_v14  ;;  %v1045_v16 = vpack.c.bf16 %v689_v15, %v689_v15 }
 0x454   : > { %710 = vrot.lane.b32.xlu0 %v1045_v16, %s1465_s16 }
 0x455   : > { %728 = vrot.lane.b32.xlu1 %v1047_v17, %s1466_s9 }
 0x4c3   : > { %v720_v0 = vpop.permute.xlu1 %719 }
 0x4c6   : > { %v711_v18 = vpop.permute.xlu0 %710 }
 0x4c7   : > { %714 = vst.msk [vmem:[#allocation3] sm:$0xf] %vm713_vm6, %v711_v18  ;;  %v729_v19 = vpop.permute.xlu1 %728 }
 0x4c8   : > { %723 = vst.msk [vmem:[#allocation3] sm:$0xf] %vm722_vm7, %v720_v0 }
 0x4c9   : > { %732 = vst.msk [vmem:[#allocation3] sm:$0xf] %vm731_vm8, %v729_v19 }
 0x4d0   : > { %v733_v20 = vld [vmem:[#allocation3] sm:$0xf] }
 0x4d1   : > { %1086 = vmatmul.mubr.msk.bf16.vlgmr.msra.gmra.mrb[4].mxu1 %vm462_vm1, %v733_v20 }
 0x4d2   : > { %1342 = shalt.err (!%p1339_p12)
}
 0x4d3   : > { %s1343_s27 = scalar_lea.hbm %s1813_s19, 256  ;;  %s1347_s13 = scalar_lea.hbm %s1960_s25, 512 }
 0x4d4   : > { %p1344_p0 = scmp.ne.s32.totalorder %s1813_s19, %s1343_s27  ;;  %p1348_p9 = scmp.lt.u32.totalorder %s1813_s19, %s1960_s25 }
 0x4d5   : > { %p1349_p4 = scmp.lt.u32.totalorder %s1347_s13, %s1343_s27  ;;  %p1351_p5 = scmp.lt.u32.totalorder %s1343_s27, %s1813_s19 }
 0x4d6   : > { %p1345_p11 = pnand %p1344_p0, %p1961_p10 }
 0x4d7   : > { %p1350_p2 = por %p1349_p4, %p1348_p9 }
 0x4d8   : > { %p1346_p1 = pneg %p1345_p11 }
 0x4d9   : > { %p1352_p13 = por %p1351_p5, %p1350_p2 }
 0x4db   : > { %p1353_p7 = pnand %p1352_p13, %p1346_p1 }
 0x4dd   : > { %1356 = shalt.err (!%p1353_p7)
}
 0x4de   : > { %s1468_s18 = smov 64   ;;  %s1469_s1 = smov 4  }
 0x4df   : > { %1102 = dma.vmem_to_hbm [thread:$0]  (%p1961_p10), %s1815_s14, 256, %s1813_s19, %s807_s8, %s1468_s18, %s1468_s18, %s1469_s1  }
 0x4e0   : > { %s1021_s16 = sshll.u32 %s1737_s12, 3  ;;  %s1962_s30 = sld [smem:[#allocation29_spill]] }
 0x4e1   : > { %s1040_s17 = sshll.u32 %s1958_s15, 7  ;;  %s429_s26 = scalar_lea.vmem [#allocation12], %s1021_s16 }
 0x4e2   : > { %s821_s23 = sshll.u32 %s429_s26, 4  ;;  %s1963_s27 = sld [smem:[#allocation30_spill]]  ;;  %s1851_s23 = int_to_ptr.vmem [resolvable:$true] %s821_s23 }
 0x4e3   : > { %s802_s15 = scalar_lea.sflag [#allocation6], %s1737_s12  ;;  %s1357_s14 = scalar_lea.vmem %s1851_s23, 128 }
 0x4e4   : > { %p1358_p3 = scmp.ne.s32.totalorder %s1851_s23, %s1357_s14  ;;  %s1470_s19 = smov [#allocation12]  }
 0x4e5   : > { %s1361_s8 = sshll.u32 %s1470_s19, 4  ;;  %s1362_s8 = int_to_ptr.vmem [resolvable:$false] %s1361_s8 }
 0x4e6   : > { %v1034_v21 = vld [vmem:[%s1962_s30] ss:$0 sm:$0xff]  ;;  %p1359_p6 = pnand %p1358_p3, %p1961_p10  ;;  %s1363_s13 = scalar_lea.vmem %s1362_s8, 256 }
 0x4e7   : > { %p1364_p12 = scmp.lt.s32.totalorder %s1851_s23, %s1362_s8  ;;  %p1365_p0 = scmp.lt.s32.totalorder %s1363_s13, %s1357_s14 }
 0x4e8   : > { %s1964_s24 = smov %s1963_s27  ;;  %s1849_s10 = scalar_lea.hbm %s1963_s27, %s1040_s17 }
 0x4e9   : > { %p1360_p8 = pneg %p1359_p6  ;;  %p1366_p11 = por %p1365_p0, %p1364_p12 }
 0x4eb   : > { %p1367_p1 = pnand %p1366_p11, %p1360_p8 }
 0x5a4   : > { %v794_v22 = vpop.f32.mrb[4].mxu1 }
 0x5a5   : > { %v795_v23 = vadd.f32 %v1034_v21, %v794_v22  ;;  %v1087_v24 = vpop.f32.mrb[5].mxu1 }
 0x5a6   : > { %v797_v25 = vpop.f32.mrb[6].mxu1 }
 0x5a7   : > { %v1088_v26 = vpop.f32.mrb[7].mxu1  ;;  %800 = vst.msk [vmem:[%s429_s26] sm:$0xff] %vm462_vm1, %v795_v23 }
 0x5a8   : > { %1370 = shalt.err (!%p1367_p1)
}
 0x5a9   : > { %s1371_s12 = scalar_lea.hbm %s1849_s10, 128  ;;  %s1375_s18 = scalar_lea.hbm %s1964_s24, 256 }
 0x5aa   : > { %p1372_p9 = scmp.ne.s32.totalorder %s1849_s10, %s1371_s12  ;;  %p1376_p5 = scmp.lt.u32.totalorder %s1849_s10, %s1964_s24 }
 0x5ab   : > { %p1377_p13 = scmp.lt.u32.totalorder %s1375_s18, %s1371_s12  ;;  %p1379_p3 = scmp.lt.u32.totalorder %s1371_s12, %s1849_s10 }
 0x5ac   : > { %p1373_p4 = pnand %p1372_p9, %p1961_p10 }
 0x5ad   : > { %p1378_p7 = por %p1377_p13, %p1376_p5 }
 0x5ae   : > { %p1374_p2 = pneg %p1373_p4 }
 0x5af   : > { %p1380_p6 = por %p1379_p3, %p1378_p7 }
 0x5b1   : > { %p1381_p8 = pnand %p1380_p6, %p1374_p2 }
 0x5b3   : > { %1384 = shalt.err (!%p1381_p8)
}
 0x5b4   : > { %1101 = dma.vmem_to_hbm [thread:$0]  (%p1961_p10), %s1851_s23, 128, %s1849_s10, %s802_s15  }
 0x5b5 PF: > { %s1965_s9 = sld [smem:[#allocation20_spill]]  ;;  %s1966_s6 = sld [smem:[#allocation27_spill]] }
 0x5b6   : > { %s1967_s30 = sld [smem:[#allocation23_spill]] }
 0x5bb   : > { %s850_s17 = sand.u32 1, %s1965_s9   ;;  %p1968_p12 = scmp.ne.s32.totalorder %s1966_s6, 0 }
 0x5bc   : > { %p1969_p0 = scmp.ge.s32.totalorder %s1967_s30, 2  ;;  %s851_s26 = scalar_lea.sflag [#allocation6], %s850_s17 }
 0x5be   : > { %p1120_p11 = pnand %p1969_p0, %p1968_p12 }
 0x5c0   : > { %1422 = dma.done.wait (!%p1120_p11), %s851_s26, 128  }
 0x5c1   : > { %1424 = vsyncadd (!%p1120_p11), %s851_s26, 4294967168  ;;  %s860_s22 = scalar_lea.sflag [#allocation14], %s850_s17 }
 0x5c2   : > { %1426 = dma.done.wait (!%p1120_p11), %s860_s22, 256  }
 0x5c3   : > { %1428 = vsyncadd (!%p1120_p11), %s860_s22, 4294967040  ;;  %s32_s10 = sadd.s32 1, %s1967_s30   ;;  %s1970_s20 = sld [smem:[#allocation25_spill]] }
 0x5c4   : > { %p29_p1 = scmp.ge.s32.totalorder %s32_s10, 4   ;;  %s1971_s30 = sld [smem:[#allocation22_spill]] }
 0x5c5   : > { %s1972_s9 = sld [smem:[#allocation24_spill]]  ;;  %s1973_s27 = smov %s1435_s28 }
 0x5c6   : > { %s1974_s28 = smov %s1439_s29  ;;  %31 = sbr.rel (!%p29_p1) target bundleno = 16 (0x10), region = 138 }
 0x5c9   : > { %s1975_s29 = smov %s1970_s20 }
 0x5cd   :  { %865 = vsyncpa [#allocation5], 1 }
 0x5ce   :  { %867 = vsyncpa [#allocation5 + $0x1], 1 }
 0x5cf   :  { %868 = vsyncpa [#allocation8], 1 }
 0x5d0   :  { %870 = vsyncpa [#allocation8 + $0x1], 1 }
 0x5d1   :  { %871 = vsyncpa [#allocation11], 1 }
 0x5d2   :  { %872 = vsyncpa [#allocation6], 1 }
 0x5d3   :  { %874 = vsyncpa [#allocation6 + $0x1], 1 }
 0x5d4   :  { %875 = vsyncpa [#allocation14], 1 }
 0x5d5   :  { %877 = vsyncpa [#allocation14 + $0x1], 1 }

// kernel: tpu_custom_call.1
= control target key start
LH: loop header
LB: loop body
LE: loop exit
PB: predicated region body
PF: predicated region fallthrough
CT: control target
= control target key end

     0   :  { %s1899_s0 = inlined_call_operand.hbm [shape: bf16[2,8,32], index: 0, kind: input, shape index: {}]   ;;  %s1900_s1 = inlined_call_operand.hbm [shape: bf16[2,8,8], index: 1, kind: input, shape index: {}]   ;;  %s1901_s2 = inlined_call_operand.hbm [shape: bf16[2,8,8], index: 2, kind: input, shape index: {}]   ;;  %s1902_s3 = inlined_call_operand.hbm [shape: bf16[32,32], index: 3, kind: input, shape index: {}]   ;;  %s1903_s4 = inlined_call_operand.vmem [shape: f32[1,32], index: 4, kind: input, shape index: {}]   ;;  %s1904_s5 = inlined_call_operand.vmem [shape: bf16[32,32], index: 5, kind: input, shape index: {}]   ;;  %s1905_s6 = inlined_call_operand.vmem [shape: f32[1,32], index: 6, kind: input, shape index: {}]   ;;  %s1906_s7 = inlined_call_operand.hbm [shape: f32[2,8,32], index: 7, kind: output, shape index: {0}]   ;;  %s1907_s8 = inlined_call_operand.hbm [shape: bf16[2,4,8,8], index: 8, kind: output, shape index: {1}]  }
   0x1   :  { %1929 = sst [smem:[#allocation28_spill]] %s1900_s1 }
   0x2   :  { %1930 = sst [smem:[#allocation29_spill]] %s1905_s6 }
   0x3   :  { %1931 = sst [smem:[#allocation30_spill]] %s1906_s7 }
   0x4   :  { %1932 = sst [smem:[#allocation31_spill]] %s1907_s8 }
   0x5   :  { %14 = vsyncpa [#allocation5], 0 }
   0x6   :  { %16 = vsyncpa [#allocation5 + $0x1], 0 }
   0x7   :  { %17 = vsyncpa [#allocation8], 0 }
   0x8   :  { %19 = vsyncpa [#allocation8 + $0x1], 0 }
   0x9   :  { %20 = vsyncpa [#allocation11], 0 }
   0xa   :  { %21 = vsyncpa [#allocation6], 0 }
   0xb   :  { %23 = vsyncpa [#allocation6 + $0x1], 0 }
   0xc   :  { %24 = vsyncpa [#allocation14], 0 }
   0xd   :  { %26 = vsyncpa [#allocation14 + $0x1], 0  ;;  %s1516_s27 = smov 0   ;;  %s1518_s28 = smov 0  }
   0xe   :  { %s1520_s29 = smov 0   ;;  %s1522_s30 = smov 0  }
   0xf   :  { %s1524_s9 = smov 0   ;;  %s1526_s10 = smov 0  }
  0x10 LB: > { %1933 = sst [smem:[#allocation20_spill]] %s1431_s27  ;;  %s44_s11 = sadd.s32 1, %s1447_s9  ;;  %s1451_s10 = sphi %s1526_s10, %s32_s10   ;;  %s1447_s9 = sphi %s1524_s9, %s1972_s9   ;;  %s1443_s30 = sphi %s1522_s30, %s1971_s30   ;;  %s1439_s29 = sphi %s1520_s29, %s1975_s29   ;;  %s1435_s28 = sphi %s1518_s28, %s1974_s28   ;;  %s1431_s27 = sphi %s1516_s27, %s1973_s27  }
  0x11   : > { %1934 = sst [smem:[#allocation21_spill]] %s1443_s30  ;;  %s53_s12 = sadd.s32 1, %s1439_s29 }
  0x12   : > { %1935 = sst [smem:[#allocation22_spill]] %s1447_s9  ;;  %p46_p0 = scmp.ge.s32.totalorder %s44_s11, 2 }
  0x13   : > { %1936 = sst [smem:[#allocation23_spill]] %s1451_s10  ;;  %p1909_p1 = scmp.ne.s32.totalorder %s1439_s29, %s1435_s28 }
  0x14   : > { %p61_p2 = scmp.eq.s32.totalorder %s1451_s10, 0  ;;  %s1977_s11 = smov (%p46_p0, %s44_s11), 0 }
  0x15   : > { %1937 = sst [smem:[#allocation24_spill]] %s1977_s11  ;;  %p1127_p5 = scmp.lt.s32.totalorder %s1451_s10, 2 }
  0x16   : > { %p62_p4 = por %p61_p2, %p1909_p1  ;;  %s48_s13 = ssub.s32 %s1447_s9, %s1977_s11 }
  0x17   : > { %s1908_s14 = sand.u32 1, %s1439_s29   ;;  %p51_p6 = scmp.eq.s32.totalorder %s48_s13, 0 }
  0x18   : > { %s1563_s15 = sshll.u32 %s1908_s14, 2  ;;  %s1566_s16 = sshll.u32 %s1447_s9, 6 }
  0x19   : > { %p1568_p7 = pnand %p1127_p5, %p62_p4  ;;  %s323_s19 = sand.u32 1, %s1451_s10  }
  0x1a   : > { %s1573_s18 = scalar_select %p51_p6, %s1439_s29, %s53_s12  }
  0x1b   : > { %s1938_s17 = scalar_select %p1568_p7, 1, 0 }
  0x1c   : > { %1939 = sst [smem:[#allocation25_spill]] %s1573_s18  ;;  %s1940_s1 = sld [smem:[#allocation28_spill]] }
  0x1d   : > { %s327_s23 = scalar_lea.vmem [#allocation7], %s1563_s15  ;;  %s1585_s25 = scalar_lea.sflag [#allocation8], %s323_s19 }
  0x1e   : > { %s334_s24 = sshll.u32 %s327_s23, 4  ;;  %p1591_p9 = pneg %p1568_p7  ;;  %s1583_s24 = int_to_ptr.vmem [resolvable:$true] %s334_s24 }
  0x20   : > { %s1941_s12 = scalar_select %p1591_p9, 1, 0 }
  0x22   : > { %s1580_s22 = scalar_lea.hbm %s1940_s1, %s1566_s16  ;;  %s1216_s21 = scalar_lea.hbm %s1940_s1, 128 }
  0x23   : > { %s1211_s26 = scalar_lea.hbm %s1580_s22, 64  ;;  %p1217_p12 = scmp.lt.u32.totalorder %s1580_s22, %s1940_s1 }
  0x24   : > { %p1212_p8 = scmp.ne.s32.totalorder %s1580_s22, %s1211_s26  ;;  %p1218_p13 = scmp.lt.u32.totalorder %s1216_s21, %s1211_s26 }
  0x25   : > { %p1220_p2 = scmp.lt.u32.totalorder %s1211_s26, %s1580_s22 }
  0x26   : > { %p1214_p10 = pnand %p1591_p9, %p1212_p8  ;;  %p1219_p0 = por %p1218_p13, %p1217_p12 }
  0x28   : > { %p1215_p11 = pneg %p1214_p10  ;;  %p1221_p4 = por %p1220_p2, %p1219_p0 }
  0x2a   : > { %p1222_p5 = pnand %p1221_p4, %p1215_p11 }
  0x2c   : > { %1225 = shalt.err (!%p1222_p5)
}
  0x2d   : > { %s1226_s19 = scalar_lea.vmem %s1583_s24, 64  ;;  %s1453_s13 = smov [#allocation7]  }
  0x2e   : > { %p1227_p6 = scmp.ne.s32.totalorder %s1583_s24, %s1226_s19  ;;  %s1231_s20 = sshll.u32 %s1453_s13, 4  ;;  %s1232_s20 = int_to_ptr.vmem [resolvable:$false] %s1231_s20 }
  0x2f   : > { %s1233_s14 = scalar_lea.vmem %s1232_s20, 128  ;;  %p1234_p3 = scmp.lt.s32.totalorder %s1583_s24, %s1232_s20 }
  0x30   : > { %p1229_p8 = pnand %p1227_p6, %p1591_p9  ;;  %p1235_p1 = scmp.lt.s32.totalorder %s1233_s14, %s1226_s19 }
  0x32   : > { %p1230_p10 = pneg %p1229_p8  ;;  %p1236_p12 = por %p1235_p1, %p1234_p3 }
  0x34   : > { %p1237_p13 = pnand %p1236_p12, %p1230_p10 }
  0x36   : > { %1240 = shalt.err (!%p1237_p13)
}
  0x37   : > { %1115 = dma.hbm_to_vmem [thread:$0]  (!%p1568_p7), %s1580_s22, 64, %s1583_s24, %s1585_s25  }
  0x38   : > { %s1616_s26 = sadd.s32 4294967295, %s1451_s10   ;;  %s1006_s21 = sadd.s32 4294967294, %s1451_s10  }
  0x39   : > { %p66_p1 = scmp.ne.s32.totalorder %s1435_s28, %s1431_s27  ;;  %p1917_p3 = scmp.eq.s32.totalorder %s1616_s26, 0 }
  0x3a   : > { %p228_p11 = scmp.eq.s32.totalorder %s1616_s26, 1  ;;  %p234_p0 = scmp.eq.s32.totalorder %s1006_s21, 1 }
  0x3b   : > { %p1007_p2 = scmp.ge.s32.totalorder %s1451_s10, 1  ;;  %p1626_p4 = por %p1917_p3, %p66_p1 }
  0x3c   : > { %p1943_p5 = scmp.ne.s32.totalorder %s1439_s29, %s1435_s28  ;;  %p1637_p8 = por %p234_p0, %p66_p1 }
  0x3d   : > { %s1942_s23 = scalar_select %p1626_p4, 1, 0 }
  0x3e   : > { %p1633_p6 = por %p228_p11, %p1943_p5  ;;  %p269_p10 = scmp.lt.s32.totalorder %s1451_s10, 3 }
  0x3f   : > { %s1946_s24 = scalar_select %p1637_p8, 1, 0 }
  0x40   : > { %s1944_s22 = scalar_select %p1633_p6, 1, 0 }
  0x41   : > { %1947 = sst [smem:[#allocation27_spill]] %s1946_s24  ;;  %p1642_p12 = pnand %p1007_p2, %p269_p10 }
  0x42   : > { %1945 = sst [smem:[#allocation26_spill]] %s1944_s22  ;;  %s1454_s13 = smov [#allocation10]  }
  0x43   : > { %s1948_s19 = scalar_select %p1642_p12, 1, 0 }
  0x44   : > { %s281_s20 = sshll.u32 %s1454_s13, 4  ;;  %p1105_p13 = pneg %p1642_p12  ;;  %s1646_s20 = int_to_ptr.vmem [resolvable:$true] %s281_s20 }
  0x45   : > { %s1660_s11 = scalar_lea.hbm %s1899_s0, %s1566_s16  ;;  %s308_s9 = scalar_lea.vmem [#allocation4], %s1563_s15 }
  0x46   : > { %p1652_p11 = pnand %p1105_p13, %p1917_p3  ;;  %s316_s18 = sshll.u32 %s308_s9, 4  ;;  %s1663_s18 = int_to_ptr.vmem [resolvable:$true] %s316_s18 }
  0x47   : > { %s1241_s24 = scalar_lea.hbm %s1902_s3, 256 }
  0x48   : > { %p1242_p1 = scmp.ne.s32.totalorder %s1902_s3, %s1241_s24  ;;  %p1243_p0 = pneg %p1652_p11 }
  0x49   : > { %p1248_p10 = scmp.lt.u32.totalorder %s1241_s24, %s1902_s3 }
  0x4a   : > { %p1244_p2 = pnand %p1243_p0, %p1242_p1 }
  0x4c   : > { %p1245_p5 = pneg %p1244_p2 }
  0x4e   : > { %p1250_p13 = pnand %p1248_p10, %p1245_p5 }
  0x50   : > { %1253 = shalt.err (!%p1250_p13)
}
  0x51   : > { %s1254_s9 = scalar_lea.vmem %s1646_s20, 256  ;;  %p1262_p4 = scmp.lt.s32.totalorder %s1646_s20, %s1646_s20 }
  0x52   : > { %p1255_p3 = scmp.ne.s32.totalorder %s1646_s20, %s1254_s9  ;;  %p1263_p12 = scmp.lt.s32.totalorder %s1254_s9, %s1254_s9 }
  0x54   : > { %p1257_p8 = pnand %p1255_p3, %p1243_p0  ;;  %p1264_p7 = por %p1263_p12, %p1262_p4 }
  0x56   : > { %p1258_p6 = pneg %p1257_p8 }
  0x58   : > { %p1265_p9 = pnand %p1264_p7, %p1258_p6 }
  0x5a   : > { %1268 = shalt.err (!%p1265_p9)
}
  0x5b   : > { %s1455_s7 = smov 64   ;;  %s1456_s27 = smov 4  }
  0x5c   : > { %1108 = dma.hbm_to_vmem [thread:$0]  (!%p1652_p11), %s1902_s3, 256, %s1646_s20, [#allocation11], %s1455_s7, %s1455_s7, %s1456_s27  }
  0x5d   : > { %s1950_s13 = sand.u32 1, %s1439_s29   ;;  %s1269_s21 = scalar_lea.hbm %s1660_s11, 64 }
  0x5e   : > { %s305_s1 = scalar_lea.sflag [#allocation5], %s1950_s13  ;;  %p1270_p7 = scmp.ne.s32.totalorder %s1660_s11, %s1269_s21 }
  0x5f   : > { %p1951_p9 = scmp.ne.s32.totalorder %s1941_s12, 0  ;;  %s1274_s8 = scalar_lea.hbm %s1899_s0, 128 }
  0x60   : > { %p1275_p6 = scmp.lt.u32.totalorder %s1660_s11, %s1899_s0  ;;  %p1276_p8 = scmp.lt.u32.totalorder %s1274_s8, %s1269_s21 }
  0x61   : > { %p1272_p3 = pnand %p1270_p7, %p1951_p9  ;;  %p1278_p1 = scmp.lt.u32.totalorder %s1269_s21, %s1660_s11 }
  0x62   : > { %p1277_p12 = por %p1276_p8, %p1275_p6 }
  0x63   : > { %p1273_p4 = pneg %p1272_p3 }
  0x64   : > { %p1279_p0 = por %p1278_p1, %p1277_p12 }
  0x66   : > { %p1280_p11 = pnand %p1279_p0, %p1273_p4 }
  0x68   : > { %1283 = shalt.err (!%p1280_p11)
}
  0x69   : > { %s1284_s20 = scalar_lea.vmem %s1663_s18, 64  ;;  %s1457_s6 = smov [#allocation4]  }
  0x6a   : > { %p1285_p2 = scmp.ne.s32.totalorder %s1663_s18, %s1284_s20  ;;  %s1289_s14 = sshll.u32 %s1457_s6, 4  ;;  %s1290_s14 = int_to_ptr.vmem [resolvable:$false] %s1289_s14 }
  0x6b   : > { %s1291_s30 = scalar_lea.vmem %s1290_s14, 128  ;;  %p1292_p13 = scmp.lt.s32.totalorder %s1663_s18, %s1290_s14 }
  0x6c   : > { %p1287_p5 = pnand %p1285_p2, %p1951_p9  ;;  %p1293_p7 = scmp.lt.s32.totalorder %s1291_s30, %s1284_s20 }
  0x6e   : > { %p1288_p10 = pneg %p1287_p5  ;;  %p1294_p3 = por %p1293_p7, %p1292_p13 }
  0x70   : > { %p1295_p6 = pnand %p1294_p3, %p1288_p10 }
  0x72   : > { %1298 = shalt.err (!%p1295_p6)
}
  0x73   : > { %p1952_p4 = scmp.ne.s32.totalorder %s1938_s17, 0  ;;  %s1713_s7 = scalar_lea.hbm %s1901_s2, %s1566_s16 }
  0x74   : > { %s345_s27 = scalar_lea.vmem [#allocation9], %s1563_s15  ;;  %s1299_s24 = scalar_lea.hbm %s1713_s7, 64 }
  0x75   : > { %1112 = dma.hbm_to_vmem [thread:$0]  (!%p1952_p4), %s1660_s11, 64, %s1663_s18, %s305_s1  }
  0x76   : > { %s352_s10 = sshll.u32 %s345_s27, 4  ;;  %p1300_p8 = scmp.ne.s32.totalorder %s1713_s7, %s1299_s24  ;;  %s353_s10 = int_to_ptr.vmem [resolvable:$true] %s352_s10 }
  0x77   : > { %s1304_s11 = scalar_lea.hbm %s1901_s2, 128  ;;  %p1305_p0 = scmp.lt.u32.totalorder %s1713_s7, %s1901_s2 }
  0x78   : > { %p1302_p12 = pnand %p1300_p8, %p1951_p9  ;;  %p1306_p11 = scmp.lt.u32.totalorder %s1304_s11, %s1299_s24 }
  0x79   : > { %p1308_p5 = scmp.lt.u32.totalorder %s1299_s24, %s1713_s7 }
  0x7a   : > { %p1303_p1 = pneg %p1302_p12  ;;  %p1307_p2 = por %p1306_p11, %p1305_p0 }
  0x7c   : > { %p1309_p10 = por %p1308_p5, %p1307_p2 }
  0x7e   : > { %p1310_p13 = pnand %p1309_p10, %p1303_p1 }
  0x80   : > { %1313 = shalt.err (!%p1310_p13)
}
  0x81   : > { %s1314_s15 = scalar_lea.vmem %s353_s10, 64  ;;  %s1458_s16 = smov [#allocation9]  }
  0x82   : > { %p1315_p7 = scmp.ne.s32.totalorder %s353_s10, %s1314_s15  ;;  %s1319_s9 = sshll.u32 %s1458_s16, 4  ;;  %s1320_s9 = int_to_ptr.vmem [resolvable:$false] %s1319_s9 }
  0x83   : > { %s1321_s20 = scalar_lea.vmem %s1320_s9, 128  ;;  %p1322_p8 = scmp.lt.s32.totalorder %s353_s10, %s1320_s9 }
  0x84   : > { %p1317_p3 = pnand %p1315_p7, %p1951_p9  ;;  %p1323_p12 = scmp.lt.s32.totalorder %s1321_s20, %s1314_s15 }
  0x86   : > { %p1318_p6 = pneg %p1317_p3  ;;  %p1324_p4 = por %p1323_p12, %p1322_p8 }
  0x88   : > { %p1325_p0 = pnand %p1324_p4, %p1318_p6 }
  0x8a   : > { %1328 = shalt.err (!%p1325_p0)
}
  0x8b   : > { %p1953_p11 = scmp.ne.s32.totalorder %s1938_s17, 0  ;;  %p1954_p1 = scmp.ne.s32.totalorder %s1948_s19, 0 }
  0x8c   : > { %s1737_s12 = sand.u32 (!%p1954_p1), 1, %s1435_s28   ;;  %p1955_p9 = scmp.ne.s32.totalorder (!%p1954_p1), %s1942_s23, 0 }
  0x8d   : > { %1118 = dma.hbm_to_vmem [thread:$0]  (!%p1953_p11), %s1713_s7, 64, %s353_s10, %s1585_s25  }
  0x8e   : > { %361 = sbr.rel (%p1954_p1) target bundleno = 1461 (0x5b5), region = 48  ;;  %s1740_s6 = sshll.u32 (!%p1954_p1), %s1737_s12, 2 }
  0x8f   : > { %s364_s14 = scalar_lea.sflag (!%p1954_p1), [#allocation5], %s1737_s12  ;;  %s367_s30 = scalar_lea.vmem (!%p1954_p1), [#allocation4], %s1740_s6 }
  0x95   : > { %1410 = dma.done.wait (%p1955_p9), %s364_s14, 64  }
  0x96   : > { %1412 = vsyncadd (%p1955_p9), %s364_s14, 4294967232  ;;  %s372_s17 = sand.u32 1, %s1616_s26   ;;  %s376_s19 = scalar_lea.vmem [#allocation7], %s1740_s6 }
  0x97   : > { %s373_s25 = scalar_lea.sflag [#allocation8], %s372_s17 }
  0x98   : > { %1414 = dma.done.wait (%p1955_p9), %s373_s25, 128  }
  0x99   : > { %1416 = vsyncadd (%p1955_p9), %s373_s25, 4294967168  ;;  %s385_s8 = scalar_lea.vmem [#allocation9], %s1740_s6  ;;  %p1956_p4 = scmp.eq.s32.totalorder %s1616_s26, 0 }
  0x9b   : > { %1418 = dma.done.wait (%p1956_p4), [#allocation11], 256   ;;  %p1957_p2 = pmov %p1956_p4 }
  0x9c   : > { %v1459_v0 = vmov 0.0   ;;  %vm1460_vm0 = vmmov 0   ;;  %v1191_v1 = vld [vmem:[#allocation10] sm:$0xff]   ;;  %v1192_v2 = vld [vmem:[#allocation10 + $0x8] sm:$0xff]   ;;  %vm462_vm1 = vcmask 261120   ;;  %vm528_vm2 = vcmask 64512  }
  0x9d   : > { %1420 = vsyncadd (%p1957_p2), [#allocation11], 4294967040  ;;  %1061 = vmatprep.subr.bf16.mxu0 %v1459_v0  ;;  %1065 = vmatprep.mubr.msk.bf16.mxu0 %vm1460_vm0, %v1459_v0  ;;  %v438_v3 = vld [vmem:[%s367_s30] sm:$0xf]  ;;  %v524_v4 = vld [vmem:[%s376_s19] sm:$0xf] }
  0x9e   : > { %1062 = vmatpush3.bf16.msra.mxu0 %v1191_v1  ;;  %v1023_v5 = vld [vmem:[%s1903_s4] ss:$0 sm:$0xff]  ;;  %1089 = vmatprep.subr.msk.bf16.mxu1 %vm528_vm2, %v524_v4  ;;  %v536_v6 = vsel %vm528_vm2, %v524_v4, 0  ;;  %vm507_vm3 = vcmask 60416   ;;  %s1461_s22 = smov 104   ;;  %s1462_s7 = smov 120  }
  0x9f   : > { %1063 = vmatprep.subr.bf16.mxu0 %v1459_v0  ;;  %1070 = vmatpush3.bf16.xpose.msra.mxu1 %v536_v6  ;;  %s1463_s27 = smov 112   ;;  %vm514_vm4 = vcmask 64516   ;;  %v525_v27 = vld [vmem:[%s385_s8] sm:$0xf]  ;;  %vm635_vm5 = vcmask 1043456   ;;  %s1022_s10 = sshll.u32 %s1737_s12, 4 }
  0xa0   : > { %1081 = vmatprep.subr.bf16.mxu1 %v1459_v0  ;;  %v637_v28 = vsel %vm635_vm5, %v525_v27, 0  ;;  %s1789_s24 = scalar_lea.vmem [#allocation13], %s1022_s10  ;;  %v1193_v4 = vld [vmem:[%s1904_s5] sm:$0xff]   ;;  %s1464_s1 = smov 16   ;;  %vm713_vm6 = vcmask 126016   ;;  %vm722_vm7 = vcmask 191616  }
  0xa1   : > { %s1958_s15 = sld [smem:[#allocation21_spill]]  ;;  %s1465_s16 = smov 8   ;;  %vm731_vm8 = vcmask 257216  }
  0xa2   : > { %1064 = vmatpush3.bf16.msra.mxu0 %v1192_v2  ;;  %s1466_s9 = smov 24   ;;  %s1959_s20 = sld [smem:[#allocation26_spill]] }
  0xa3   : > { %1090 = vmatprep.subr.msk.bf16.mxu0 %vm635_vm5, %v525_v27  ;;  %s835_s14 = sshll.u32 %s1789_s24, 4  ;;  %s1960_s25 = sld [smem:[#allocation31_spill]]  ;;  %s1815_s14 = int_to_ptr.vmem [resolvable:$true] %s835_s14 }
  0xa4   : > { %s807_s8 = scalar_lea.sflag [#allocation14], %s1737_s12  ;;  %s1329_s26 = scalar_lea.vmem %s1815_s14, 256 }
  0xa5   : > { %1066 = vmatmul.mubr.msk.bf16.vlgmr.msra.gmra.mrb[0].mxu0 %vm462_vm1, %v438_v3  ;;  %p1330_p5 = scmp.ne.s32.totalorder %s1815_s14, %s1329_s26  ;;  %s1467_s23 = smov [#allocation13]  }
  0xa6   : > { %1076 = vmatpush3.bf16.msra.mxu0 %v637_v28 }
  0xa7   : > { %s1048_s6 = sshll.u32 %s1958_s15, 8 }
  0xa8   : > { %p1961_p10 = scmp.ne.s32.totalorder %s1959_s20, 0 }
  0xa9   : > { %s1813_s19 = scalar_lea.hbm %s1960_s25, %s1048_s6 }
  0xaa   : > { %p1331_p13 = pnand %p1330_p5, %p1961_p10 }
  0xac   : > { %p1332_p7 = pneg %p1331_p13 }
 0x178   : > { %v500_v7 = vpop.f32.mrb[0].mxu0 }
 0x179   : > { %v501_v8 = vadd.f32 %v1023_v5, %v500_v7  ;;  %v1067_v9 = vpop.f32.mrb[1].mxu0  ;;  %v1194_v5 = vld [vmem:[%s1904_s5 + $0x8] sm:$0xff]  }
 0x17a   : > { %v503_v10 = vpop.f32.mrb[2].mxu0 }
 0x17b   : > { %v506_v11 = vpack.c.bf16 %v501_v8, %v501_v8  ;;  %v1068_v12 = vpop.f32.mrb[3].mxu0 }
 0x17d   : > { %508 = vst.msk [vmem:[#allocation2] sm:$0xf] %vm507_vm3, %v506_v11  ;;  %v510_v13 = vrot.slane %v506_v11, 4 }
 0x17f   : > { %520 = vrot.lane.b32.xlu1 %v510_v13, %s1461_s22  ;;  %511 = vrot.lane.b32.xlu0 %v510_v13, %s1462_s7  ;;  %s1333_s22 = sshll.u32 %s1467_s23, 4  ;;  %s1334_s22 = int_to_ptr.vmem [resolvable:$false] %s1333_s22 }
 0x180   : > { %s1335_s7 = scalar_lea.vmem %s1334_s22, 512  ;;  %p1336_p3 = scmp.lt.s32.totalorder %s1815_s14, %s1334_s22 }
 0x181   : > { %p1337_p6 = scmp.lt.s32.totalorder %s1335_s7, %s1329_s26 }
 0x183   : > { %516 = vrot.lane.b32.xlu0 %v506_v11, %s1463_s27  ;;  %p1338_p8 = por %p1337_p6, %p1336_p3 }
 0x185   : > { %p1339_p12 = pnand %p1338_p8, %p1332_p7 }
 0x1f1   : > { %v521_v14 = vpop.permute.xlu1 %520  ;;  %v512_v15 = vpop.permute.xlu0 %511 }
 0x1f2   : > { %523 = vst.msk [vmem:[#allocation2 + $0x8] sm:$0xf0] %vm514_vm4, %v521_v14  ;;  %515 = vst.msk [vmem:[#allocation2] sm:$0xf0] %vm514_vm4, %v512_v15 }
 0x1f5   : > { %v517_v16 = vpop.permute.xlu0 %516 }
 0x1f6   : > { %519 = vst.msk [vmem:[#allocation2 + $0x8] sm:$0xf] %vm507_vm3, %v517_v16 }
 0x1f9   : > { %v526_v17 = vld [vmem:[#allocation2] sm:$0xff] }
 0x1fa   : > { %1071 = vmatprep.mubr.msk.bf16.mxu1 %vm528_vm2, %v526_v17 }
 0x1fd   : > { %v527_v18 = vld [vmem:[#allocation2 + $0x8] sm:$0xff] }
 0x1fe   : > { %1072 = vmatmul.mubr.msk.bf16.vlgmr.msra.gmra.mrb[0].mxu1 %vm528_vm2, %v527_v18 }
 0x1ff   : > { %1085 = vmatprep.mubr.msk.bf16.mxu1 %vm1460_vm0, %v1459_v0  ;;  %1082 = vmatpush3.bf16.msra.mxu1 %v1193_v4 }
 0x200   : > { %1083 = vmatprep.subr.bf16.mxu1 %v1459_v0 }
 0x203   : > { %1084 = vmatpush3.bf16.msra.mxu1 %v1194_v5 }
 0x2d1   : > { %v1073_v19 = vpop.f32.mrb[0].mxu1 }
 0x2d2   : > { %v572_v20 = vpop.f32.mrb[1].mxu1  ;;  %v593_v26 = vsel %vm528_vm2, %v1073_v19, -inf }
 0x2d3   : > { %v1074_v21 = vpop.f32.mrb[2].mxu1  ;;  %v587_v22 = vsel %vm528_vm2, %v572_v20, -inf }
 0x2d4   : > { %588 = vmax.xlane.f32.xlu1 %v587_v22  ;;  %v575_v23 = vpop.f32.mrb[3].mxu1  ;;  %v596_v25 = vsel %vm528_vm2, %v1074_v21, -inf }
 0x2d5   : > { %v590_v24 = vsel %vm528_vm2, %v575_v23, -inf }
 0x2d6   : > { %591 = vmax.xlane.f32.xlu0 %v590_v24 }
 0x2d8   : > { %597 = vmax.xlane.f32.xlu1 %v596_v25 }
 0x2da   : > { %594 = vmax.xlane.f32.xlu0 %v593_v26 }
 0x361   : > { %v589_v29 = vpop.xlane.xlu1 %588 }
 0x362   : > { %v599_v30 = vsub.f32 %v572_v20, %v589_v29 }
 0x363   : > { %v592_v31 = vpop.xlane.xlu0 %591 }
 0x364   : > { %v603_v32 = vmul.f32 1.442695, %v599_v30  ;;  %v600_v33 = vsub.f32 %v575_v23, %v592_v31 }
 0x365   : > { %v598_v34 = vpop.xlane.xlu1 %597 }
 0x366   : > { %v605_v35 = vmul.f32 1.442695, %v600_v33  ;;  %v602_v36 = vsub.f32 %v1074_v21, %v598_v34  ;;  %1195 = vpow2.f32 %v603_v32 }
 0x367   : > { %v595_v37 = vpop.xlane.xlu0 %594 }
 0x368   : > { %1197 = vpow2.f32 %v605_v35  ;;  %v609_v38 = vmul.f32 1.442695, %v602_v36  ;;  %v601_v39 = vsub.f32 %v1073_v19, %v595_v37 }
 0x36a   : > { %1199 = vpow2.f32 %v609_v38  ;;  %v607_v40 = vmul.f32 1.442695, %v601_v39 }
 0x36c   : > { %1201 = vpow2.f32 %v607_v40 }
 0x370   : > { %v1196_v41 = vpop.eup %1195 }
 0x371   : > { %v611_v50 = vsel %vm528_vm2, %v1196_v41, 0.0 }
 0x372   : > { %v1198_v42 = vpop.eup %1197 }
 0x373   : > { %v614_v43 = vsel %vm528_vm2, %v1198_v42, 0.0  ;;  %v627_v44 = vpack.c.bf16 %v1198_v42, %v1196_v41 }
 0x374   : > { %v1200_v45 = vpop.eup %1199  ;;  %615 = vadd.xlane.f32.xlu0 %v614_v43 }
 0x375   : > { %1077 = vmatprep.mubr.msk.bf16.mxu0 %vm528_vm2, %v627_v44  ;;  %v620_v47 = vsel %vm528_vm2, %v1200_v45, 0.0 }
 0x376   : > { %v1202_v46 = vpop.eup %1201 }
 0x377   : > { %v617_v48 = vsel %vm528_vm2, %v1202_v46, 0.0  ;;  %v628_v49 = vpack.c.bf16 %v1200_v45, %v1202_v46 }
 0x378   : > { %621 = vadd.xlane.f32.xlu0 %v620_v47  ;;  %618 = vadd.xlane.f32.xlu1 %v617_v48 }
 0x379   : > { %1078 = vmatmul.mubr.msk.bf16.vlgmr.msra.gmra.mrb[4].mxu0 %vm528_vm2, %v628_v49 }
 0x37c   : > { %612 = vadd.xlane.f32.xlu1 %v611_v50 }
 0x401   : > { %v616_v51 = vpop.xlane.xlu0 %615 }
 0x402   : > { %1203 = vrcp.f32 %v616_v51 }
 0x405   : > { %v619_v52 = vpop.xlane.xlu1 %618  ;;  %v622_v53 = vpop.xlane.xlu0 %621 }
 0x406   : > { %1205 = vrcp.f32 %v619_v52 }
 0x407   : > { %1207 = vrcp.f32 %v622_v53 }
 0x409   : > { %v613_v54 = vpop.xlane.xlu1 %612 }
 0x40a   : > { %1209 = vrcp.f32 %v613_v54 }
 0x40c   : > { %v1204_v55 = vpop.eup %1203 }
 0x40d   : > { %v693_v56 = vmul.f32 %v1204_v55, %v1198_v42 }
 0x40f   : > { %v697_v57 = vpack.c.bf16 %v693_v56, %v693_v56 }
 0x410   : > { %v1206_v58 = vpop.eup %1205 }
 0x411   : > { %v1208_v59 = vpop.eup %1207  ;;  %701 = vst.msk [vmem:[%s1789_s24 + $0x4] sm:$0xf] %vm507_vm3, %v697_v57  ;;  %v694_v60 = vmul.f32 %v1206_v58, %v1202_v46 }
 0x412   : > { %v695_v61 = vmul.f32 %v1208_v59, %v1200_v45 }
 0x413   : > { %v698_v62 = vpack.c.bf16 %v694_v60, %v694_v60 }
 0x414   : > { %v1210_v63 = vpop.eup %1209  ;;  %v699_v1 = vpack.c.bf16 %v695_v61, %v695_v61 }
 0x415   : > { %702 = vst.msk [vmem:[%s1789_s24 + $0x8] sm:$0xf] %vm507_vm3, %v698_v62  ;;  %v692_v2 = vmul.f32 %v1210_v63, %v1196_v41 }
 0x416   : > { %703 = vst.msk [vmem:[%s1789_s24 + $0xc] sm:$0xf] %vm507_vm3, %v699_v1 }
 0x417   : > { %v696_v3 = vpack.c.bf16 %v692_v2, %v692_v2 }
 0x419   : > { %700 = vst.msk [vmem:[%s1789_s24] sm:$0xf] %vm507_vm3, %v696_v3 }
 0x44c   : > { %v1079_v6 = vpop.f32.mrb[4].mxu0 }
 0x44d   : > { %v690_v7 = vmul.f32 %v1206_v58, %v1079_v6  ;;  %v673_v8 = vpop.f32.mrb[5].mxu0 }
 0x44e   : > { %v688_v9 = vmul.f32 %v1210_v63, %v673_v8  ;;  %v1080_v10 = vpop.f32.mrb[6].mxu0 }
 0x44f   : > { %v1046_v11 = vpack.c.bf16 %v690_v7, %v690_v7  ;;  %v691_v12 = vmul.f32 %v1208_v59, %v1080_v10  ;;  %v676_v13 = vpop.f32.mrb[7].mxu0 }
 0x450   : > { %v704_v14 = vpack.c.bf16 %v688_v9, %v688_v9  ;;  %v689_v15 = vmul.f32 %v1204_v55, %v676_v13 }
 0x451   : > { %719 = vrot.lane.b32.xlu1 %v1046_v11, %s1464_s1  ;;  %v1047_v17 = vpack.c.bf16 %v691_v12, %v691_v12 }
 0x452   : > { %705 = vst.msk [vmem:[#allocation3] sm:$0xf] %vm507_vm3, %v704_v14  ;;  %v1045_v16 = vpack.c.bf16 %v689_v15, %v689_v15 }
 0x454   : > { %710 = vrot.lane.b32.xlu0 %v1045_v16, %s1465_s16 }
 0x455   : > { %728 = vrot.lane.b32.xlu1 %v1047_v17, %s1466_s9 }
 0x4c3   : > { %v720_v0 = vpop.permute.xlu1 %719 }
 0x4c6   : > { %v711_v18 = vpop.permute.xlu0 %710 }
 0x4c7   : > { %714 = vst.msk [vmem:[#allocation3] sm:$0xf] %vm713_vm6, %v711_v18  ;;  %v729_v19 = vpop.permute.xlu1 %728 }
 0x4c8   : > { %723 = vst.msk [vmem:[#allocation3] sm:$0xf] %vm722_vm7, %v720_v0 }
 0x4c9   : > { %732 = vst.msk [vmem:[#allocation3] sm:$0xf] %vm731_vm8, %v729_v19 }
 0x4d0   : > { %v733_v20 = vld [vmem:[#allocation3] sm:$0xf] }
 0x4d1   : > { %1086 = vmatmul.mubr.msk.bf16.vlgmr.msra.gmra.mrb[4].mxu1 %vm462_vm1, %v733_v20 }
 0x4d2   : > { %1342 = shalt.err (!%p1339_p12)
}
 0x4d3   : > { %s1343_s27 = scalar_lea.hbm %s1813_s19, 256  ;;  %s1347_s13 = scalar_lea.hbm %s1960_s25, 512 }
 0x4d4   : > { %p1344_p0 = scmp.ne.s32.totalorder %s1813_s19, %s1343_s27  ;;  %p1348_p9 = scmp.lt.u32.totalorder %s1813_s19, %s1960_s25 }
 0x4d5   : > { %p1349_p4 = scmp.lt.u32.totalorder %s1347_s13, %s1343_s27  ;;  %p1351_p5 = scmp.lt.u32.totalorder %s1343_s27, %s1813_s19 }
 0x4d6   : > { %p1345_p11 = pnand %p1344_p0, %p1961_p10 }
 0x4d7   : > { %p1350_p2 = por %p1349_p4, %p1348_p9 }
 0x4d8   : > { %p1346_p1 = pneg %p1345_p11 }
 0x4d9   : > { %p1352_p13 = por %p1351_p5, %p1350_p2 }
 0x4db   : > { %p1353_p7 = pnand %p1352_p13, %p1346_p1 }
 0x4dd   : > { %1356 = shalt.err (!%p1353_p7)
}
 0x4de   : > { %s1468_s18 = smov 64   ;;  %s1469_s1 = smov 4  }
 0x4df   : > { %1102 = dma.vmem_to_hbm [thread:$0]  (%p1961_p10), %s1815_s14, 256, %s1813_s19, %s807_s8, %s1468_s18, %s1468_s18, %s1469_s1  }
 0x4e0   : > { %s1021_s16 = sshll.u32 %s1737_s12, 3  ;;  %s1962_s30 = sld [smem:[#allocation29_spill]] }
 0x4e1   : > { %s1040_s17 = sshll.u32 %s1958_s15, 7  ;;  %s429_s26 = scalar_lea.vmem [#allocation12], %s1021_s16 }
 0x4e2   : > { %s821_s23 = sshll.u32 %s429_s26, 4  ;;  %s1963_s27 = sld [smem:[#allocation30_spill]]  ;;  %s1851_s23 = int_to_ptr.vmem [resolvable:$true] %s821_s23 }
 0x4e3   : > { %s802_s15 = scalar_lea.sflag [#allocation6], %s1737_s12  ;;  %s1357_s14 = scalar_lea.vmem %s1851_s23, 128 }
 0x4e4   : > { %p1358_p3 = scmp.ne.s32.totalorder %s1851_s23, %s1357_s14  ;;  %s1470_s19 = smov [#allocation12]  }
 0x4e5   : > { %s1361_s8 = sshll.u32 %s1470_s19, 4  ;;  %s1362_s8 = int_to_ptr.vmem [resolvable:$false] %s1361_s8 }
 0x4e6   : > { %v1034_v21 = vld [vmem:[%s1962_s30] ss:$0 sm:$0xff]  ;;  %p1359_p6 = pnand %p1358_p3, %p1961_p10  ;;  %s1363_s13 = scalar_lea.vmem %s1362_s8, 256 }
 0x4e7   : > { %p1364_p12 = scmp.lt.s32.totalorder %s1851_s23, %s1362_s8  ;;  %p1365_p0 = scmp.lt.s32.totalorder %s1363_s13, %s1357_s14 }
 0x4e8   : > { %s1964_s24 = smov %s1963_s27  ;;  %s1849_s10 = scalar_lea.hbm %s1963_s27, %s1040_s17 }
 0x4e9   : > { %p1360_p8 = pneg %p1359_p6  ;;  %p1366_p11 = por %p1365_p0, %p1364_p12 }
 0x4eb   : > { %p1367_p1 = pnand %p1366_p11, %p1360_p8 }
 0x5a4   : > { %v794_v22 = vpop.f32.mrb[4].mxu1 }
 0x5a5   : > { %v795_v23 = vadd.f32 %v1034_v21, %v794_v22  ;;  %v1087_v24 = vpop.f32.mrb[5].mxu1 }
 0x5a6   : > { %v797_v25 = vpop.f32.mrb[6].mxu1 }
 0x5a7   : > { %v1088_v26 = vpop.f32.mrb[7].mxu1  ;;  %800 = vst.msk [vmem:[%s429_s26] sm:$0xff] %vm462_vm1, %v795_v23 }
 0x5a8   : > { %1370 = shalt.err (!%p1367_p1)
}
 0x5a9   : > { %s1371_s12 = scalar_lea.hbm %s1849_s10, 128  ;;  %s1375_s18 = scalar_lea.hbm %s1964_s24, 256 }
 0x5aa   : > { %p1372_p9 = scmp.ne.s32.totalorder %s1849_s10, %s1371_s12  ;;  %p1376_p5 = scmp.lt.u32.totalorder %s1849_s10, %s1964_s24 }
 0x5ab   : > { %p1377_p13 = scmp.lt.u32.totalorder %s1375_s18, %s1371_s12  ;;  %p1379_p3 = scmp.lt.u32.totalorder %s1371_s12, %s1849_s10 }
 0x5ac   : > { %p1373_p4 = pnand %p1372_p9, %p1961_p10 }
 0x5ad   : > { %p1378_p7 = por %p1377_p13, %p1376_p5 }
 0x5ae   : > { %p1374_p2 = pneg %p1373_p4 }
 0x5af   : > { %p1380_p6 = por %p1379_p3, %p1378_p7 }
 0x5b1   : > { %p1381_p8 = pnand %p1380_p6, %p1374_p2 }
 0x5b3   : > { %1384 = shalt.err (!%p1381_p8)
}
 0x5b4   : > { %1101 = dma.vmem_to_hbm [thread:$0]  (%p1961_p10), %s1851_s23, 128, %s1849_s10, %s802_s15  }
 0x5b5 PF: > { %s1965_s9 = sld [smem:[#allocation20_spill]]  ;;  %s1966_s6 = sld [smem:[#allocation27_spill]] }
 0x5b6   : > { %s1967_s30 = sld [smem:[#allocation23_spill]] }
 0x5bb   : > { %s850_s17 = sand.u32 1, %s1965_s9   ;;  %p1968_p12 = scmp.ne.s32.totalorder %s1966_s6, 0 }
 0x5bc   : > { %p1969_p0 = scmp.ge.s32.totalorder %s1967_s30, 2  ;;  %s851_s26 = scalar_lea.sflag [#allocation6], %s850_s17 }
 0x5be   : > { %p1120_p11 = pnand %p1969_p0, %p1968_p12 }
 0x5c0   : > { %1422 = dma.done.wait (!%p1120_p11), %s851_s26, 128  }
 0x5c1   : > { %1424 = vsyncadd (!%p1120_p11), %s851_s26, 4294967168  ;;  %s860_s22 = scalar_lea.sflag [#allocation14], %s850_s17 }
 0x5c2   : > { %1426 = dma.done.wait (!%p1120_p11), %s860_s22, 256  }
 0x5c3   : > { %1428 = vsyncadd (!%p1120_p11), %s860_s22, 4294967040  ;;  %s32_s10 = sadd.s32 1, %s1967_s30   ;;  %s1970_s20 = sld [smem:[#allocation25_spill]] }
 0x5c4   : > { %p29_p1 = scmp.ge.s32.totalorder %s32_s10, 4   ;;  %s1971_s30 = sld [smem:[#allocation22_spill]] }
 0x5c5   : > { %s1972_s9 = sld [smem:[#allocation24_spill]]  ;;  %s1973_s27 = smov %s1435_s28 }
 0x5c6   : > { %s1974_s28 = smov %s1439_s29  ;;  %31 = sbr.rel (!%p29_p1) target bundleno = 16 (0x10), region = 138 }
 0x5c9   : > { %s1975_s29 = smov %s1970_s20 }
 0x5cd   :  { %865 = vsyncpa [#allocation5], 1 }
 0x5ce   :  { %867 = vsyncpa [#allocation5 + $0x1], 1 }
 0x5cf   :  { %868 = vsyncpa [#allocation8], 1 }
 0x5d0   :  { %870 = vsyncpa [#allocation8 + $0x1], 1 }
 0x5d1   :  { %871 = vsyncpa [#allocation11], 1 }
 0x5d2   :  { %872 = vsyncpa [#allocation6], 1 }
 0x5d3   :  { %874 = vsyncpa [#allocation6 + $0x1], 1 }
 0x5d4   :  { %875 = vsyncpa [#allocation14], 1 }
 0x5d5   :  { %877 = vsyncpa [#allocation14 + $0x1], 1 }

</bundles_post_ra>
